<compile_context>
chip_gen: v6e
topology: v6e:2x2x1
jax: 0.10.0
libtpu: 0.0.40
codegen_flags: <defaults>
</compile_context>

<pallas_src>
import numpy as np
import jax
import jax.numpy as jnp
from jax.experimental import pallas as pl
from jax.experimental.pallas import tpu as pltpu

F_ENC = 10  # fixed in the reference module


def _recombinator_kernel(w0_ref, w1_ref, w2_ref, w3_ref,
                         Wlin_ref, blin_ref, Wqx_ref, bqx_ref,
                         Wkt_ref, bkt_ref, Wv0t_ref, bv0t_ref,
                         Ssum_ref, Wf_ref, bf_ref, out_ref):
    F = F_ENC
    FF = F * F
    C = Wf_ref.shape[1] // 4
    w_refs = (w0_ref, w1_ref, w2_ref, w3_ref)

    # [1] per-stream hidden projections.
    # TODO(synk): training-mode Dropout(p=0.2) not implemented; eval semantics.
    h = [jnp.dot(w_refs[i][...], Wlin_ref[i],
                 preferred_element_type=jnp.float32) + blin_ref[i]
         for i in range(4)]

    # [2] lane-packed projections straight off the MXU:
    #       qx_i[b, j*F+l] = q_i[b, j] / sqrt(F)   (scale folded into Wqx/bqx)
    #       kt_i[b, j*F+l] = k_i[b, l]
    #       v0t [b, n*F+m] = v0 [b, m]
    #     (v_enc_1..3 are dead code in the reference: only stream 0's V is used.)
    s = None
    for i in range(4):
        qx = jnp.dot(h[i], Wqx_ref[i], preferred_element_type=jnp.float32) + bqx_ref[i]
        kt = jnp.dot(h[i], Wkt_ref[i], preferred_element_type=jnp.float32) + bkt_ref[i]
        s = qx * kt if s is None else s + qx * kt            # (bb, 128)
    v0t = (jnp.dot(h[0], Wv0t_ref[...],
                   preferred_element_type=jnp.float32) + bv0t_ref[...])[:, :FF]
    s = s[:, :FF]                                            # (bb, 100) score slab

    # [3] softmax over j (dim=1 of the (B, j, l) tensor), on the packed slab.
    m = s[:, 0:F]
    for j in range(1, F):
        m = jnp.maximum(m, s[:, j * F:(j + 1) * F])          # per-l max over j
    e = jnp.exp(s - jnp.concatenate([m] * F, axis=1))        # one EUP pass
    den_t = jnp.dot(e, Ssum_ref[...],                        # tiled per-l denom (MXU)
                    preferred_element_type=jnp.float32)
    a = e * pl.reciprocal(den_t, approx=True)                # attn_flat (bb, 100)

    # [4] attention_output[:, 0, :] folded into the fused class heads:
    #     logits = (a * v0t) @ Wf_exp + bf, with Wf_exp[n*F+m, :] = Wf[n, :].
    logits = jnp.dot(a * v0t, Wf_ref[...],
                     preferred_element_type=jnp.float32) + bf_ref[...]   # (bb, 4C)

    # [5] per-head softmax: single exp, exact division, then average.
    parts = []
    for hd in range(4):
        lh = logits[:, hd * C:(hd + 1) * C]
        parts.append(lh - jnp.max(lh, axis=1, keepdims=True))
    pe = jnp.exp(jnp.concatenate(parts, axis=1))
    probs = None
    for hd in range(4):
        ph = pe[:, hd * C:(hd + 1) * C]
        ph = ph / jnp.sum(ph, axis=1, keepdims=True)
        probs = ph if probs is None else probs + ph
    probs = 0.25 * probs                                     # (bb, C)

    # [6] one lane-dense 128-wide store: [attn_flat | probs | zero pad].
    bb = out_ref.shape[0]
    pad = out_ref.shape[1] - FF - C
    pieces = [a, probs]
    if pad:
        pieces.append(jnp.zeros((bb, pad), jnp.float32))
    out_ref[...] = jnp.concatenate(pieces, axis=1)


def _round_up(x, m):
    return ((x + m - 1) // m) * m


def fuse_params(p):
    """Precompute lane-packed / fused weights for the kernel."""
    F = F_ENC
    scale = 1.0 / float(np.sqrt(F))
    GW = 128  # lane-aligned group width

    def pad_lanes(x):
        return jnp.pad(x, ((0, 0), (0, GW - x.shape[1])))

    Wqx, bqx, Wkt, bkt = [], [], [], []
    for i in range(4):
        # pre-broadcast Q: col (j*F + l) = scale * Wq[i][:, j]
        Wqx.append(pad_lanes(jnp.repeat(p["Wq"][i] * scale, F, axis=1)))
        bqx.append(pad_lanes(jnp.repeat(p["bq"][i] * scale, F, axis=1)))
        # tiled K: col (j*F + l) = Wk[i][:, l]
        Wkt.append(pad_lanes(jnp.tile(p["Wk"][i], (1, F))))
        bkt.append(pad_lanes(jnp.tile(p["bk"][i], (1, F))))
    # tiled V for stream 0: col (n*F + m) = Wv[0][:, m]
    Wv0t = pad_lanes(jnp.tile(p["Wv"][0], (1, F)))
    bv0t = pad_lanes(jnp.tile(p["bv"][0], (1, F)))

    # denominator-broadcast matrix: Ssum[j*F+l, n*F+m] = (l == m)
    Ssum = jnp.asarray(np.tile(np.eye(F, dtype=np.float32), (F, F)))

    # row-expanded final heads: Wf_exp[n*F+m, hd*C + c] = Wf[hd][n, c]
    Wf_exp = jnp.concatenate([jnp.repeat(p["Wf"][i], F, axis=0) for i in range(4)],
                             axis=1)                                     # (100, 4C)
    bf = jnp.concatenate([p["bf"][i] for i in range(4)], axis=1)         # (1, 4C)

    return dict(Wlin=p["Wlin"].astype(jnp.float32),
                blin=p["blin"].astype(jnp.float32),
                Wqx=jnp.stack(Wqx), bqx=jnp.stack(bqx),
                Wkt=jnp.stack(Wkt), bkt=jnp.stack(bkt),
                Wv0t=Wv0t, bv0t=bv0t, Ssum=Ssum, Wf=Wf_exp, bf=bf)


def recombinator_forward(w0, w1, w2, w3, fused, block_b=512):
    B, in_f = w0.shape
    C = fused["Wf"].shape[1] // 4
    FF = F_ENC * F_ENC
    out_w = _round_up(FF + C, 128)

    # >= 2 grid steps when possible (v7x has 2 TensorCores), capped at block_b.
    bb = min(_round_up(block_b, 8), max(8, _round_up(-(-B // 2), 8)))
    Bp = _round_up(B, bb)

    ws = [w.astype(jnp.float32) for w in (w0, w1, w2, w3)]
    if Bp != B:
        ws = [jnp.pad(w, ((0, Bp - B), (0, 0))) for w in ws]

    batch_map = lambda b: (b, 0)
    const2 = lambda b: (0, 0)
    const3 = lambda b: (0, 0, 0)

    res = pl.pallas_call(
        _recombinator_kernel,
        out_shape=jax.ShapeDtypeStruct((Bp, out_w), jnp.float32),
        grid_spec=pltpu.PrefetchScalarGridSpec(
            num_scalar_prefetch=0,
            grid=(Bp // bb,),
            in_specs=[
                pl.BlockSpec((bb, in_f), batch_map),
                pl.BlockSpec((bb, in_f), batch_map),
                pl.BlockSpec((bb, in_f), batch_map),
                pl.BlockSpec((bb, in_f), batch_map),
                pl.BlockSpec(fused["Wlin"].shape, const3),
                pl.BlockSpec(fused["blin"].shape, const3),
                pl.BlockSpec(fused["Wqx"].shape, const3),
                pl.BlockSpec(fused["bqx"].shape, const3),
                pl.BlockSpec(fused["Wkt"].shape, const3),
                pl.BlockSpec(fused["bkt"].shape, const3),
                pl.BlockSpec(fused["Wv0t"].shape, const2),
                pl.BlockSpec(fused["bv0t"].shape, const2),
                pl.BlockSpec(fused["Ssum"].shape, const2),
                pl.BlockSpec(fused["Wf"].shape, const2),
                pl.BlockSpec(fused["bf"].shape, const2),
            ],
            out_specs=pl.BlockSpec((bb, out_w), batch_map),
        ),
        compiler_params=pltpu.CompilerParams(
            dimension_semantics=("parallel",),
            vmem_limit_bytes=24 * 1024 * 1024),
    )(*ws, fused["Wlin"], fused["blin"], fused["Wqx"], fused["bqx"],
      fused["Wkt"], fused["bkt"], fused["Wv0t"], fused["bv0t"],
      fused["Ssum"], fused["Wf"], fused["bf"])

    outputs = res[:B, FF:FF + C]
    attn = res[:B, :FF].reshape(B, F_ENC, F_ENC)
    return outputs, attn


def init_params(key, in_features, hidden, num_classes):
    ks = jax.random.split(key, 10)

    def u(k, shape, fan_in):
        bound = 1.0 / np.sqrt(fan_in)
        return jax.random.uniform(k, shape, jnp.float32, -bound, bound)

    return {
        "Wlin": u(ks[0], (4, in_features, hidden), in_features),
        "blin": u(ks[1], (4, 1, hidden), in_features),
        "Wq": u(ks[2], (4, hidden, F_ENC), hidden),
        "bq": u(ks[3], (4, 1, F_ENC), hidden),
        "Wk": u(ks[4], (4, hidden, F_ENC), hidden),
        "bk": u(ks[5], (4, 1, F_ENC), hidden),
        "Wv": u(ks[6], (4, hidden, F_ENC), hidden),
        "bv": u(ks[7], (4, 1, F_ENC), hidden),
        "Wf": u(ks[8], (4, F_ENC, num_classes), F_ENC),
        "bf": u(ks[9], (4, 1, num_classes), F_ENC),
    }


def reference_forward(w0, w1, w2, w3, p):
    """Pure-JAX replica of the PyTorch forward (eval mode), for validation."""
    ws = [w0, w1, w2, w3]
    hs = [ws[i] @ p["Wlin"][i] + p["blin"][i] for i in range(4)]
    q = jnp.stack([hs[i] @ p["Wq"][i] + p["bq"][i] for i in range(4)], axis=1)
    k = jnp.stack([hs[i] @ p["Wk"][i] + p["bk"][i] for i in range(4)], axis=1)
    v = jnp.stack([hs[i] @ p["Wv"][i] + p["bv"][i] for i in range(4)], axis=1)
    attn = jnp.einsum("bij,bil->bjl", q, k) / np.sqrt(F_ENC)
    attn = jax.nn.softmax(attn, axis=1)
    att_out = jnp.einsum("bnm,bhm->bhn", attn, v)
    x = att_out[:, 0, :]
    outs = [jax.nn.softmax(x @ p["Wf"][i] + p["bf"][i], axis=1) for i in range(4)]
    return 0.25 * (outs[0] + outs[1] + outs[2] + outs[3]), attn


if __name__ == "__main__":
    in_features, hidden, num_classes = 32, 32, 4

    key = jax.random.PRNGKey(0)
    k_in, k_par = jax.random.split(key)
    params = init_params(k_par, in_features, hidden, num_classes)
    fused = fuse_params(params)

    # Case 1: plain small batch.  Case 2: non-multiple batch exercising padding
    # and a 2-step "parallel" grid.  Case 3: multi-step grid with a smaller tile.
    for B, block_b in ((8, 512), (13, 512), (200, 64)):
        kw = jax.random.split(jax.random.fold_in(k_in, B), 4)
        w = [jax.random.normal(kw[i], (B, in_features), jnp.float32) for i in range(4)]

        outputs, attn = recombinator_forward(w[0], w[1], w[2], w[3], fused,
                                             block_b=block_b)
        outputs = jax.block_until_ready(outputs)
        attn = jax.block_until_ready(attn)

        ref_out, ref_attn = reference_forward(w[0], w[1], w[2], w[3], params)
        # approx reciprocal (attention softmax only) loosens tolerance slightly.
        assert np.allclose(np.asarray(outputs), np.asarray(ref_out),
                           atol=1e-2, rtol=1e-2), f"outputs mismatch (B={B})"
        assert np.allclose(np.asarray(attn), np.asarray(ref_attn),
                           atol=1e-2, rtol=1e-2), f"attn mismatch (B={B})"

    print("KERNEL_OK")
</pallas_src>

<mosaic_0001>
module attributes {stable_mosaic.version = 11 : i64} {
  func.func @_recombinator_kernel(%arg0: i32, %arg1: memref<8x32xf32, #tpu.memory_space<vmem>>, %arg2: memref<8x32xf32, #tpu.memory_space<vmem>>, %arg3: memref<8x32xf32, #tpu.memory_space<vmem>>, %arg4: memref<8x32xf32, #tpu.memory_space<vmem>>, %arg5: memref<4x32x32xf32, #tpu.memory_space<vmem>>, %arg6: memref<4x1x32xf32, #tpu.memory_space<vmem>>, %arg7: memref<4x32x128xf32, #tpu.memory_space<vmem>>, %arg8: memref<4x1x128xf32, #tpu.memory_space<vmem>>, %arg9: memref<4x32x128xf32, #tpu.memory_space<vmem>>, %arg10: memref<4x1x128xf32, #tpu.memory_space<vmem>>, %arg11: memref<32x128xf32, #tpu.memory_space<vmem>>, %arg12: memref<1x128xf32, #tpu.memory_space<vmem>>, %arg13: memref<100x100xf32, #tpu.memory_space<vmem>>, %arg14: memref<100x16xf32, #tpu.memory_space<vmem>>, %arg15: memref<1x16xf32, #tpu.memory_space<vmem>>, %arg16: memref<8x128xf32, #tpu.memory_space<vmem>>) attributes {dimension_semantics = [#tpu.dimension_semantics<parallel>], iteration_bounds = array<i64: 1>, scalar_prefetch = 0 : i64, scratch_operands = 0 : i64, tpu.core_type = #tpu.core_type<tc>, window_params = [{transform_indices = @transform_0, window_bounds = array<i64: 8, 32>}, {transform_indices = @transform_1, window_bounds = array<i64: 8, 32>}, {transform_indices = @transform_2, window_bounds = array<i64: 8, 32>}, {transform_indices = @transform_3, window_bounds = array<i64: 8, 32>}, {pipeline_mode = #tpu.pipeline_mode<synchronous>, transform_indices = @transform_4, window_bounds = array<i64: 4, 32, 32>}, {pipeline_mode = #tpu.pipeline_mode<synchronous>, transform_indices = @transform_5, window_bounds = array<i64: 4, 1, 32>}, {pipeline_mode = #tpu.pipeline_mode<synchronous>, transform_indices = @transform_6, window_bounds = array<i64: 4, 32, 128>}, {pipeline_mode = #tpu.pipeline_mode<synchronous>, transform_indices = @transform_7, window_bounds = array<i64: 4, 1, 128>}, {pipeline_mode = #tpu.pipeline_mode<synchronous>, transform_indices = @transform_8, window_bounds = array<i64: 4, 32, 128>}, {pipeline_mode = #tpu.pipeline_mode<synchronous>, transform_indices = @transform_9, window_bounds = array<i64: 4, 1, 128>}, {pipeline_mode = #tpu.pipeline_mode<synchronous>, transform_indices = @transform_10, window_bounds = array<i64: 32, 128>}, {pipeline_mode = #tpu.pipeline_mode<synchronous>, transform_indices = @transform_11, window_bounds = array<i64: 1, 128>}, {pipeline_mode = #tpu.pipeline_mode<synchronous>, transform_indices = @transform_12, window_bounds = array<i64: 100, 100>}, {pipeline_mode = #tpu.pipeline_mode<synchronous>, transform_indices = @transform_13, window_bounds = array<i64: 100, 16>}, {pipeline_mode = #tpu.pipeline_mode<synchronous>, transform_indices = @transform_14, window_bounds = array<i64: 1, 16>}, {transform_indices = @transform_15, window_bounds = array<i64: 8, 128>}]} {
    %c0 = arith.constant 0 : index
    %c0_0 = arith.constant 0 : index
    %0 = vector.load %arg1[%c0, %c0_0] : memref<8x32xf32, #tpu.memory_space<vmem>>, vector<8x32xf32>
    %c0_1 = arith.constant 0 : index
    %c0_2 = arith.constant 0 : index
    %c0_3 = arith.constant 0 : index
    %1 = vector.load %arg5[%c0_1, %c0_2, %c0_3] : memref<4x32x32xf32, #tpu.memory_space<vmem>>, vector<1x32x32xf32>
    %2 = vector.shape_cast %1 : vector<1x32x32xf32> to vector<32x32xf32>
    %cst = arith.constant dense<0.000000e+00> : vector<8x32xf32>
    %3 = tpu.matmul %0, %2, %cst {dimension_numbers = #tpu.dot_dimension_numbers<[1], [0], [0], [1], [0, 0, 1, 1], [], []>} : vector<8x32xf32>, vector<32x32xf32>, vector<8x32xf32> -> vector<8x32xf32>
    %c0_4 = arith.constant 0 : index
    %c0_5 = arith.constant 0 : index
    %c0_6 = arith.constant 0 : index
    %4 = vector.load %arg6[%c0_4, %c0_5, %c0_6] : memref<4x1x32xf32, #tpu.memory_space<vmem>>, vector<1x1x32xf32>
    %5 = vector.shape_cast %4 : vector<1x1x32xf32> to vector<1x32xf32>
    %6 = vector.broadcast %5 : vector<1x32xf32> to vector<8x32xf32>
    %7 = arith.addf %3, %6 : vector<8x32xf32>
    %c0_7 = arith.constant 0 : index
    %c0_8 = arith.constant 0 : index
    %8 = vector.load %arg2[%c0_7, %c0_8] : memref<8x32xf32, #tpu.memory_space<vmem>>, vector<8x32xf32>
    %c1 = arith.constant 1 : index
    %c0_9 = arith.constant 0 : index
    %c0_10 = arith.constant 0 : index
    %9 = vector.load %arg5[%c1, %c0_9, %c0_10] : memref<4x32x32xf32, #tpu.memory_space<vmem>>, vector<1x32x32xf32>
    %10 = vector.shape_cast %9 : vector<1x32x32xf32> to vector<32x32xf32>
    %cst_11 = arith.constant dense<0.000000e+00> : vector<8x32xf32>
    %11 = tpu.matmul %8, %10, %cst_11 {dimension_numbers = #tpu.dot_dimension_numbers<[1], [0], [0], [1], [0, 0, 1, 1], [], []>} : vector<8x32xf32>, vector<32x32xf32>, vector<8x32xf32> -> vector<8x32xf32>
    %c1_12 = arith.constant 1 : index
    %c0_13 = arith.constant 0 : index
    %c0_14 = arith.constant 0 : index
    %12 = vector.load %arg6[%c1_12, %c0_13, %c0_14] : memref<4x1x32xf32, #tpu.memory_space<vmem>>, vector<1x1x32xf32>
    %13 = vector.shape_cast %12 : vector<1x1x32xf32> to vector<1x32xf32>
    %14 = vector.broadcast %13 : vector<1x32xf32> to vector<8x32xf32>
    %15 = arith.addf %11, %14 : vector<8x32xf32>
    %c0_15 = arith.constant 0 : index
    %c0_16 = arith.constant 0 : index
    %16 = vector.load %arg3[%c0_15, %c0_16] : memref<8x32xf32, #tpu.memory_space<vmem>>, vector<8x32xf32>
    %c2 = arith.constant 2 : index
    %c0_17 = arith.constant 0 : index
    %c0_18 = arith.constant 0 : index
    %17 = vector.load %arg5[%c2, %c0_17, %c0_18] : memref<4x32x32xf32, #tpu.memory_space<vmem>>, vector<1x32x32xf32>
    %18 = vector.shape_cast %17 : vector<1x32x32xf32> to vector<32x32xf32>
    %cst_19 = arith.constant dense<0.000000e+00> : vector<8x32xf32>
    %19 = tpu.matmul %16, %18, %cst_19 {dimension_numbers = #tpu.dot_dimension_numbers<[1], [0], [0], [1], [0, 0, 1, 1], [], []>} : vector<8x32xf32>, vector<32x32xf32>, vector<8x32xf32> -> vector<8x32xf32>
    %c2_20 = arith.constant 2 : index
    %c0_21 = arith.constant 0 : index
    %c0_22 = arith.constant 0 : index
    %20 = vector.load %arg6[%c2_20, %c0_21, %c0_22] : memref<4x1x32xf32, #tpu.memory_space<vmem>>, vector<1x1x32xf32>
    %21 = vector.shape_cast %20 : vector<1x1x32xf32> to vector<1x32xf32>
    %22 = vector.broadcast %21 : vector<1x32xf32> to vector<8x32xf32>
    %23 = arith.addf %19, %22 : vector<8x32xf32>
    %c0_23 = arith.constant 0 : index
    %c0_24 = arith.constant 0 : index
    %24 = vector.load %arg4[%c0_23, %c0_24] : memref<8x32xf32, #tpu.memory_space<vmem>>, vector<8x32xf32>
    %c3 = arith.constant 3 : index
    %c0_25 = arith.constant 0 : index
    %c0_26 = arith.constant 0 : index
    %25 = vector.load %arg5[%c3, %c0_25, %c0_26] : memref<4x32x32xf32, #tpu.memory_space<vmem>>, vector<1x32x32xf32>
    %26 = vector.shape_cast %25 : vector<1x32x32xf32> to vector<32x32xf32>
    %cst_27 = arith.constant dense<0.000000e+00> : vector<8x32xf32>
    %27 = tpu.matmul %24, %26, %cst_27 {dimension_numbers = #tpu.dot_dimension_numbers<[1], [0], [0], [1], [0, 0, 1, 1], [], []>} : vector<8x32xf32>, vector<32x32xf32>, vector<8x32xf32> -> vector<8x32xf32>
    %c3_28 = arith.constant 3 : index
    %c0_29 = arith.constant 0 : index
    %c0_30 = arith.constant 0 : index
    %28 = vector.load %arg6[%c3_28, %c0_29, %c0_30] : memref<4x1x32xf32, #tpu.memory_space<vmem>>, vector<1x1x32xf32>
    %29 = vector.shape_cast %28 : vector<1x1x32xf32> to vector<1x32xf32>
    %30 = vector.broadcast %29 : vector<1x32xf32> to vector<8x32xf32>
    %31 = arith.addf %27, %30 : vector<8x32xf32>
    %c0_31 = arith.constant 0 : index
    %c0_32 = arith.constant 0 : index
    %c0_33 = arith.constant 0 : index
    %32 = vector.load %arg7[%c0_31, %c0_32, %c0_33] : memref<4x32x128xf32, #tpu.memory_space<vmem>>, vector<1x32x128xf32>
    %33 = vector.shape_cast %32 : vector<1x32x128xf32> to vector<32x128xf32>
    %cst_34 = arith.constant dense<0.000000e+00> : vector<8x128xf32>
    %34 = tpu.matmul %7, %33, %cst_34 {dimension_numbers = #tpu.dot_dimension_numbers<[1], [0], [0], [1], [0, 0, 1, 1], [], []>} : vector<8x32xf32>, vector<32x128xf32>, vector<8x128xf32> -> vector<8x128xf32>
    %c0_35 = arith.constant 0 : index
    %c0_36 = arith.constant 0 : index
    %c0_37 = arith.constant 0 : index
    %35 = vector.load %arg8[%c0_35, %c0_36, %c0_37] : memref<4x1x128xf32, #tpu.memory_space<vmem>>, vector<1x1x128xf32>
    %36 = vector.shape_cast %35 : vector<1x1x128xf32> to vector<1x128xf32>
    %37 = vector.broadcast %36 : vector<1x128xf32> to vector<8x128xf32>
    %38 = arith.addf %34, %37 : vector<8x128xf32>
    %c0_38 = arith.constant 0 : index
    %c0_39 = arith.constant 0 : index
    %c0_40 = arith.constant 0 : index
    %39 = vector.load %arg9[%c0_38, %c0_39, %c0_40] : memref<4x32x128xf32, #tpu.memory_space<vmem>>, vector<1x32x128xf32>
    %40 = vector.shape_cast %39 : vector<1x32x128xf32> to vector<32x128xf32>
    %cst_41 = arith.constant dense<0.000000e+00> : vector<8x128xf32>
    %41 = tpu.matmul %7, %40, %cst_41 {dimension_numbers = #tpu.dot_dimension_numbers<[1], [0], [0], [1], [0, 0, 1, 1], [], []>} : vector<8x32xf32>, vector<32x128xf32>, vector<8x128xf32> -> vector<8x128xf32>
    %c0_42 = arith.constant 0 : index
    %c0_43 = arith.constant 0 : index
    %c0_44 = arith.constant 0 : index
    %42 = vector.load %arg10[%c0_42, %c0_43, %c0_44] : memref<4x1x128xf32, #tpu.memory_space<vmem>>, vector<1x1x128xf32>
    %43 = vector.shape_cast %42 : vector<1x1x128xf32> to vector<1x128xf32>
    %44 = vector.broadcast %43 : vector<1x128xf32> to vector<8x128xf32>
    %45 = arith.addf %41, %44 : vector<8x128xf32>
    %46 = arith.mulf %38, %45 : vector<8x128xf32>
    %c1_45 = arith.constant 1 : index
    %c0_46 = arith.constant 0 : index
    %c0_47 = arith.constant 0 : index
    %47 = vector.load %arg7[%c1_45, %c0_46, %c0_47] : memref<4x32x128xf32, #tpu.memory_space<vmem>>, vector<1x32x128xf32>
    %48 = vector.shape_cast %47 : vector<1x32x128xf32> to vector<32x128xf32>
    %cst_48 = arith.constant dense<0.000000e+00> : vector<8x128xf32>
    %49 = tpu.matmul %15, %48, %cst_48 {dimension_numbers = #tpu.dot_dimension_numbers<[1], [0], [0], [1], [0, 0, 1, 1], [], []>} : vector<8x32xf32>, vector<32x128xf32>, vector<8x128xf32> -> vector<8x128xf32>
    %c1_49 = arith.constant 1 : index
    %c0_50 = arith.constant 0 : index
    %c0_51 = arith.constant 0 : index
    %50 = vector.load %arg8[%c1_49, %c0_50, %c0_51] : memref<4x1x128xf32, #tpu.memory_space<vmem>>, vector<1x1x128xf32>
    %51 = vector.shape_cast %50 : vector<1x1x128xf32> to vector<1x128xf32>
    %52 = vector.broadcast %51 : vector<1x128xf32> to vector<8x128xf32>
    %53 = arith.addf %49, %52 : vector<8x128xf32>
    %c1_52 = arith.constant 1 : index
    %c0_53 = arith.constant 0 : index
    %c0_54 = arith.constant 0 : index
    %54 = vector.load %arg9[%c1_52, %c0_53, %c0_54] : memref<4x32x128xf32, #tpu.memory_space<vmem>>, vector<1x32x128xf32>
    %55 = vector.shape_cast %54 : vector<1x32x128xf32> to vector<32x128xf32>
    %cst_55 = arith.constant dense<0.000000e+00> : vector<8x128xf32>
    %56 = tpu.matmul %15, %55, %cst_55 {dimension_numbers = #tpu.dot_dimension_numbers<[1], [0], [0], [1], [0, 0, 1, 1], [], []>} : vector<8x32xf32>, vector<32x128xf32>, vector<8x128xf32> -> vector<8x128xf32>
    %c1_56 = arith.constant 1 : index
    %c0_57 = arith.constant 0 : index
    %c0_58 = arith.constant 0 : index
    %57 = vector.load %arg10[%c1_56, %c0_57, %c0_58] : memref<4x1x128xf32, #tpu.memory_space<vmem>>, vector<1x1x128xf32>
    %58 = vector.shape_cast %57 : vector<1x1x128xf32> to vector<1x128xf32>
    %59 = vector.broadcast %58 : vector<1x128xf32> to vector<8x128xf32>
    %60 = arith.addf %56, %59 : vector<8x128xf32>
    %61 = arith.mulf %53, %60 : vector<8x128xf32>
    %62 = arith.addf %46, %61 : vector<8x128xf32>
    %c2_59 = arith.constant 2 : index
    %c0_60 = arith.constant 0 : index
    %c0_61 = arith.constant 0 : index
    %63 = vector.load %arg7[%c2_59, %c0_60, %c0_61] : memref<4x32x128xf32, #tpu.memory_space<vmem>>, vector<1x32x128xf32>
    %64 = vector.shape_cast %63 : vector<1x32x128xf32> to vector<32x128xf32>
    %cst_62 = arith.constant dense<0.000000e+00> : vector<8x128xf32>
    %65 = tpu.matmul %23, %64, %cst_62 {dimension_numbers = #tpu.dot_dimension_numbers<[1], [0], [0], [1], [0, 0, 1, 1], [], []>} : vector<8x32xf32>, vector<32x128xf32>, vector<8x128xf32> -> vector<8x128xf32>
    %c2_63 = arith.constant 2 : index
    %c0_64 = arith.constant 0 : index
    %c0_65 = arith.constant 0 : index
    %66 = vector.load %arg8[%c2_63, %c0_64, %c0_65] : memref<4x1x128xf32, #tpu.memory_space<vmem>>, vector<1x1x128xf32>
    %67 = vector.shape_cast %66 : vector<1x1x128xf32> to vector<1x128xf32>
    %68 = vector.broadcast %67 : vector<1x128xf32> to vector<8x128xf32>
    %69 = arith.addf %65, %68 : vector<8x128xf32>
    %c2_66 = arith.constant 2 : index
    %c0_67 = arith.constant 0 : index
    %c0_68 = arith.constant 0 : index
    %70 = vector.load %arg9[%c2_66, %c0_67, %c0_68] : memref<4x32x128xf32, #tpu.memory_space<vmem>>, vector<1x32x128xf32>
    %71 = vector.shape_cast %70 : vector<1x32x128xf32> to vector<32x128xf32>
    %cst_69 = arith.constant dense<0.000000e+00> : vector<8x128xf32>
    %72 = tpu.matmul %23, %71, %cst_69 {dimension_numbers = #tpu.dot_dimension_numbers<[1], [0], [0], [1], [0, 0, 1, 1], [], []>} : vector<8x32xf32>, vector<32x128xf32>, vector<8x128xf32> -> vector<8x128xf32>
    %c2_70 = arith.constant 2 : index
    %c0_71 = arith.constant 0 : index
    %c0_72 = arith.constant 0 : index
    %73 = vector.load %arg10[%c2_70, %c0_71, %c0_72] : memref<4x1x128xf32, #tpu.memory_space<vmem>>, vector<1x1x128xf32>
    %74 = vector.shape_cast %73 : vector<1x1x128xf32> to vector<1x128xf32>
    %75 = vector.broadcast %74 : vector<1x128xf32> to vector<8x128xf32>
    %76 = arith.addf %72, %75 : vector<8x128xf32>
    %77 = arith.mulf %69, %76 : vector<8x128xf32>
    %78 = arith.addf %62, %77 : vector<8x128xf32>
    %c3_73 = arith.constant 3 : index
    %c0_74 = arith.constant 0 : index
    %c0_75 = arith.constant 0 : index
    %79 = vector.load %arg7[%c3_73, %c0_74, %c0_75] : memref<4x32x128xf32, #tpu.memory_space<vmem>>, vector<1x32x128xf32>
    %80 = vector.shape_cast %79 : vector<1x32x128xf32> to vector<32x128xf32>
    %cst_76 = arith.constant dense<0.000000e+00> : vector<8x128xf32>
    %81 = tpu.matmul %31, %80, %cst_76 {dimension_numbers = #tpu.dot_dimension_numbers<[1], [0], [0], [1], [0, 0, 1, 1], [], []>} : vector<8x32xf32>, vector<32x128xf32>, vector<8x128xf32> -> vector<8x128xf32>
    %c3_77 = arith.constant 3 : index
    %c0_78 = arith.constant 0 : index
    %c0_79 = arith.constant 0 : index
    %82 = vector.load %arg8[%c3_77, %c0_78, %c0_79] : memref<4x1x128xf32, #tpu.memory_space<vmem>>, vector<1x1x128xf32>
    %83 = vector.shape_cast %82 : vector<1x1x128xf32> to vector<1x128xf32>
    %84 = vector.broadcast %83 : vector<1x128xf32> to vector<8x128xf32>
    %85 = arith.addf %81, %84 : vector<8x128xf32>
    %c3_80 = arith.constant 3 : index
    %c0_81 = arith.constant 0 : index
    %c0_82 = arith.constant 0 : index
    %86 = vector.load %arg9[%c3_80, %c0_81, %c0_82] : memref<4x32x128xf32, #tpu.memory_space<vmem>>, vector<1x32x128xf32>
    %87 = vector.shape_cast %86 : vector<1x32x128xf32> to vector<32x128xf32>
    %cst_83 = arith.constant dense<0.000000e+00> : vector<8x128xf32>
    %88 = tpu.matmul %31, %87, %cst_83 {dimension_numbers = #tpu.dot_dimension_numbers<[1], [0], [0], [1], [0, 0, 1, 1], [], []>} : vector<8x32xf32>, vector<32x128xf32>, vector<8x128xf32> -> vector<8x128xf32>
    %c3_84 = arith.constant 3 : index
    %c0_85 = arith.constant 0 : index
    %c0_86 = arith.constant 0 : index
    %89 = vector.load %arg10[%c3_84, %c0_85, %c0_86] : memref<4x1x128xf32, #tpu.memory_space<vmem>>, vector<1x1x128xf32>
    %90 = vector.shape_cast %89 : vector<1x1x128xf32> to vector<1x128xf32>
    %91 = vector.broadcast %90 : vector<1x128xf32> to vector<8x128xf32>
    %92 = arith.addf %88, %91 : vector<8x128xf32>
    %93 = arith.mulf %85, %92 : vector<8x128xf32>
    %94 = arith.addf %78, %93 : vector<8x128xf32>
    %c0_87 = arith.constant 0 : index
    %c0_88 = arith.constant 0 : index
    %95 = vector.load %arg11[%c0_87, %c0_88] : memref<32x128xf32, #tpu.memory_space<vmem>>, vector<32x128xf32>
    %cst_89 = arith.constant dense<0.000000e+00> : vector<8x128xf32>
    %96 = tpu.matmul %7, %95, %cst_89 {dimension_numbers = #tpu.dot_dimension_numbers<[1], [0], [0], [1], [0, 0, 1, 1], [], []>} : vector<8x32xf32>, vector<32x128xf32>, vector<8x128xf32> -> vector<8x128xf32>
    %c0_90 = arith.constant 0 : index
    %c0_91 = arith.constant 0 : index
    %97 = vector.load %arg12[%c0_90, %c0_91] : memref<1x128xf32, #tpu.memory_space<vmem>>, vector<1x128xf32>
    %98 = vector.broadcast %97 : vector<1x128xf32> to vector<8x128xf32>
    %99 = arith.addf %96, %98 : vector<8x128xf32>
    %100 = vector.extract_strided_slice %99 {offsets = [0, 0], sizes = [8, 100], strides = [1, 1]} : vector<8x128xf32> to vector<8x100xf32>
    %101 = vector.extract_strided_slice %94 {offsets = [0, 0], sizes = [8, 100], strides = [1, 1]} : vector<8x128xf32> to vector<8x100xf32>
    %102 = vector.extract_strided_slice %101 {offsets = [0, 0], sizes = [8, 10], strides = [1, 1]} : vector<8x100xf32> to vector<8x10xf32>
    %103 = vector.extract_strided_slice %101 {offsets = [0, 10], sizes = [8, 10], strides = [1, 1]} : vector<8x100xf32> to vector<8x10xf32>
    %104 = arith.maximumf %102, %103 : vector<8x10xf32>
    %105 = vector.extract_strided_slice %101 {offsets = [0, 20], sizes = [8, 10], strides = [1, 1]} : vector<8x100xf32> to vector<8x10xf32>
    %106 = arith.maximumf %104, %105 : vector<8x10xf32>
    %107 = vector.extract_strided_slice %101 {offsets = [0, 30], sizes = [8, 10], strides = [1, 1]} : vector<8x100xf32> to vector<8x10xf32>
    %108 = arith.maximumf %106, %107 : vector<8x10xf32>
    %109 = vector.extract_strided_slice %101 {offsets = [0, 40], sizes = [8, 10], strides = [1, 1]} : vector<8x100xf32> to vector<8x10xf32>
    %110 = arith.maximumf %108, %109 : vector<8x10xf32>
    %111 = vector.extract_strided_slice %101 {offsets = [0, 50], sizes = [8, 10], strides = [1, 1]} : vector<8x100xf32> to vector<8x10xf32>
    %112 = arith.maximumf %110, %111 : vector<8x10xf32>
    %113 = vector.extract_strided_slice %101 {offsets = [0, 60], sizes = [8, 10], strides = [1, 1]} : vector<8x100xf32> to vector<8x10xf32>
    %114 = arith.maximumf %112, %113 : vector<8x10xf32>
    %115 = vector.extract_strided_slice %101 {offsets = [0, 70], sizes = [8, 10], strides = [1, 1]} : vector<8x100xf32> to vector<8x10xf32>
    %116 = arith.maximumf %114, %115 : vector<8x10xf32>
    %117 = vector.extract_strided_slice %101 {offsets = [0, 80], sizes = [8, 10], strides = [1, 1]} : vector<8x100xf32> to vector<8x10xf32>
    %118 = arith.maximumf %116, %117 : vector<8x10xf32>
    %119 = vector.extract_strided_slice %101 {offsets = [0, 90], sizes = [8, 10], strides = [1, 1]} : vector<8x100xf32> to vector<8x10xf32>
    %120 = arith.maximumf %118, %119 : vector<8x10xf32>
    %121 = tpu.concatenate %120, %120, %120, %120, %120, %120, %120, %120, %120, %120 in 1 : vector<8x10xf32>, vector<8x10xf32>, vector<8x10xf32>, vector<8x10xf32>, vector<8x10xf32>, vector<8x10xf32>, vector<8x10xf32>, vector<8x10xf32>, vector<8x10xf32>, vector<8x10xf32> -> vector<8x100xf32>
    %122 = arith.subf %101, %121 : vector<8x100xf32>
    %123 = math.exp %122 : vector<8x100xf32>
    %c0_92 = arith.constant 0 : index
    %c0_93 = arith.constant 0 : index
    %124 = vector.load %arg13[%c0_92, %c0_93] : memref<100x100xf32, #tpu.memory_space<vmem>>, vector<100x100xf32>
    %cst_94 = arith.constant dense<0.000000e+00> : vector<8x100xf32>
    %125 = tpu.matmul %123, %124, %cst_94 {dimension_numbers = #tpu.dot_dimension_numbers<[1], [0], [0], [1], [0, 0, 1, 1], [], []>} : vector<8x100xf32>, vector<100x100xf32>, vector<8x100xf32> -> vector<8x100xf32>
    %126 = tpu.reciprocal %125 {approx = true} : vector<8x100xf32> -> vector<8x100xf32>
    %127 = arith.mulf %123, %126 : vector<8x100xf32>
    %128 = arith.mulf %127, %100 : vector<8x100xf32>
    %c0_95 = arith.constant 0 : index
    %c0_96 = arith.constant 0 : index
    %129 = vector.load %arg14[%c0_95, %c0_96] : memref<100x16xf32, #tpu.memory_space<vmem>>, vector<100x16xf32>
    %cst_97 = arith.constant dense<0.000000e+00> : vector<8x16xf32>
    %130 = tpu.matmul %128, %129, %cst_97 {dimension_numbers = #tpu.dot_dimension_numbers<[1], [0], [0], [1], [0, 0, 1, 1], [], []>} : vector<8x100xf32>, vector<100x16xf32>, vector<8x16xf32> -> vector<8x16xf32>
    %c0_98 = arith.constant 0 : index
    %c0_99 = arith.constant 0 : index
    %131 = vector.load %arg15[%c0_98, %c0_99] : memref<1x16xf32, #tpu.memory_space<vmem>>, vector<1x16xf32>
    %132 = vector.broadcast %131 : vector<1x16xf32> to vector<8x16xf32>
    %133 = arith.addf %130, %132 : vector<8x16xf32>
    %134 = vector.extract_strided_slice %133 {offsets = [0, 0], sizes = [8, 4], strides = [1, 1]} : vector<8x16xf32> to vector<8x4xf32>
    %cst_100 = arith.constant dense<0xFF800000> : vector<8xf32>
    %135 = vector.multi_reduction <maximumf>, %134, %cst_100 [1] : vector<8x4xf32> to vector<8xf32>
    %136 = vector.shape_cast %135 : vector<8xf32> to vector<8x1xf32>
    %137 = vector.broadcast %136 : vector<8x1xf32> to vector<8x4xf32>
    %138 = arith.subf %134, %137 : vector<8x4xf32>
    %139 = vector.extract_strided_slice %133 {offsets = [0, 4], sizes = [8, 4], strides = [1, 1]} : vector<8x16xf32> to vector<8x4xf32>
    %cst_101 = arith.constant dense<0xFF800000> : vector<8xf32>
    %140 = vector.multi_reduction <maximumf>, %139, %cst_101 [1] : vector<8x4xf32> to vector<8xf32>
    %141 = vector.shape_cast %140 : vector<8xf32> to vector<8x1xf32>
    %142 = vector.broadcast %141 : vector<8x1xf32> to vector<8x4xf32>
    %143 = arith.subf %139, %142 : vector<8x4xf32>
    %144 = vector.extract_strided_slice %133 {offsets = [0, 8], sizes = [8, 4], strides = [1, 1]} : vector<8x16xf32> to vector<8x4xf32>
    %cst_102 = arith.constant dense<0xFF800000> : vector<8xf32>
    %145 = vector.multi_reduction <maximumf>, %144, %cst_102 [1] : vector<8x4xf32> to vector<8xf32>
    %146 = vector.shape_cast %145 : vector<8xf32> to vector<8x1xf32>
    %147 = vector.broadcast %146 : vector<8x1xf32> to vector<8x4xf32>
    %148 = arith.subf %144, %147 : vector<8x4xf32>
    %149 = vector.extract_strided_slice %133 {offsets = [0, 12], sizes = [8, 4], strides = [1, 1]} : vector<8x16xf32> to vector<8x4xf32>
    %cst_103 = arith.constant dense<0xFF800000> : vector<8xf32>
    %150 = vector.multi_reduction <maximumf>, %149, %cst_103 [1] : vector<8x4xf32> to vector<8xf32>
    %151 = vector.shape_cast %150 : vector<8xf32> to vector<8x1xf32>
    %152 = vector.broadcast %151 : vector<8x1xf32> to vector<8x4xf32>
    %153 = arith.subf %149, %152 : vector<8x4xf32>
    %154 = tpu.concatenate %138, %143, %148, %153 in 1 : vector<8x4xf32>, vector<8x4xf32>, vector<8x4xf32>, vector<8x4xf32> -> vector<8x16xf32>
    %155 = math.exp %154 : vector<8x16xf32>
    %156 = vector.extract_strided_slice %155 {offsets = [0, 0], sizes = [8, 4], strides = [1, 1]} : vector<8x16xf32> to vector<8x4xf32>
    %cst_104 = arith.constant dense<0.000000e+00> : vector<8xf32>
    %157 = vector.multi_reduction <add>, %156, %cst_104 [1] : vector<8x4xf32> to vector<8xf32>
    %158 = vector.shape_cast %157 : vector<8xf32> to vector<8x1xf32>
    %159 = vector.broadcast %158 : vector<8x1xf32> to vector<8x4xf32>
    %160 = arith.divf %156, %159 : vector<8x4xf32>
    %161 = vector.extract_strided_slice %155 {offsets = [0, 4], sizes = [8, 4], strides = [1, 1]} : vector<8x16xf32> to vector<8x4xf32>
    %cst_105 = arith.constant dense<0.000000e+00> : vector<8xf32>
    %162 = vector.multi_reduction <add>, %161, %cst_105 [1] : vector<8x4xf32> to vector<8xf32>
    %163 = vector.shape_cast %162 : vector<8xf32> to vector<8x1xf32>
    %164 = vector.broadcast %163 : vector<8x1xf32> to vector<8x4xf32>
    %165 = arith.divf %161, %164 : vector<8x4xf32>
    %166 = arith.addf %160, %165 : vector<8x4xf32>
    %167 = vector.extract_strided_slice %155 {offsets = [0, 8], sizes = [8, 4], strides = [1, 1]} : vector<8x16xf32> to vector<8x4xf32>
    %cst_106 = arith.constant dense<0.000000e+00> : vector<8xf32>
    %168 = vector.multi_reduction <add>, %167, %cst_106 [1] : vector<8x4xf32> to vector<8xf32>
    %169 = vector.shape_cast %168 : vector<8xf32> to vector<8x1xf32>
    %170 = vector.broadcast %169 : vector<8x1xf32> to vector<8x4xf32>
    %171 = arith.divf %167, %170 : vector<8x4xf32>
    %172 = arith.addf %166, %171 : vector<8x4xf32>
    %173 = vector.extract_strided_slice %155 {offsets = [0, 12], sizes = [8, 4], strides = [1, 1]} : vector<8x16xf32> to vector<8x4xf32>
    %cst_107 = arith.constant dense<0.000000e+00> : vector<8xf32>
    %174 = vector.multi_reduction <add>, %173, %cst_107 [1] : vector<8x4xf32> to vector<8xf32>
    %175 = vector.shape_cast %174 : vector<8xf32> to vector<8x1xf32>
    %176 = vector.broadcast %175 : vector<8x1xf32> to vector<8x4xf32>
    %177 = arith.divf %173, %176 : vector<8x4xf32>
    %178 = arith.addf %172, %177 : vector<8x4xf32>
    %cst_108 = arith.constant 2.500000e-01 : f32
    %179 = vector.broadcast %cst_108 : f32 to vector<8x4xf32>
    %180 = arith.mulf %179, %178 : vector<8x4xf32>
    %cst_109 = arith.constant 0.000000e+00 : f32
    %181 = vector.broadcast %cst_109 : f32 to vector<8x24xf32>
    %182 = tpu.concatenate %127, %180, %181 in 1 : vector<8x100xf32>, vector<8x4xf32>, vector<8x24xf32> -> vector<8x128xf32>
    %c0_110 = arith.constant 0 : index
    %c0_111 = arith.constant 0 : index
    %183 = vector.load %arg16[%c0_110, %c0_111] : memref<8x128xf32, #tpu.memory_space<vmem>>, vector<8x128xf32>
    tpu.vector_store %arg16[%c0_110, %c0_111], %182 {strides = array<i32>} : memref<8x128xf32, #tpu.memory_space<vmem>>, vector<8x128xf32>,
    return
  }
  func.func @transform_0(%arg0: i32) -> (i32, i32) {
    %c0_i32 = arith.constant 0 : i32
    %c0_i32_0 = arith.constant 0 : i32
    return %arg0, %c0_i32 : i32, i32
  }
  func.func @transform_1(%arg0: i32) -> (i32, i32) {
    %c0_i32 = arith.constant 0 : i32
    %c0_i32_0 = arith.constant 0 : i32
    return %arg0, %c0_i32 : i32, i32
  }
  func.func @transform_2(%arg0: i32) -> (i32, i32) {
    %c0_i32 = arith.constant 0 : i32
    %c0_i32_0 = arith.constant 0 : i32
    return %arg0, %c0_i32 : i32, i32
  }
  func.func @transform_3(%arg0: i32) -> (i32, i32) {
    %c0_i32 = arith.constant 0 : i32
    %c0_i32_0 = arith.constant 0 : i32
    return %arg0, %c0_i32 : i32, i32
  }
  func.func @transform_4(%arg0: i32) -> (i32, i32, i32) {
    %c0_i32 = arith.constant 0 : i32
    %c0_i32_0 = arith.constant 0 : i32
    %c0_i32_1 = arith.constant 0 : i32
    %c0_i32_2 = arith.constant 0 : i32
    return %c0_i32, %c0_i32_0, %c0_i32_1 : i32, i32, i32
  }
  func.func @transform_5(%arg0: i32) -> (i32, i32, i32) {
    %c0_i32 = arith.constant 0 : i32
    %c0_i32_0 = arith.constant 0 : i32
    %c0_i32_1 = arith.constant 0 : i32
    %c0_i32_2 = arith.constant 0 : i32
    return %c0_i32, %c0_i32_0, %c0_i32_1 : i32, i32, i32
  }
  func.func @transform_6(%arg0: i32) -> (i32, i32, i32) {
    %c0_i32 = arith.constant 0 : i32
    %c0_i32_0 = arith.constant 0 : i32
    %c0_i32_1 = arith.constant 0 : i32
    %c0_i32_2 = arith.constant 0 : i32
    return %c0_i32, %c0_i32_0, %c0_i32_1 : i32, i32, i32
  }
  func.func @transform_7(%arg0: i32) -> (i32, i32, i32) {
    %c0_i32 = arith.constant 0 : i32
    %c0_i32_0 = arith.constant 0 : i32
    %c0_i32_1 = arith.constant 0 : i32
    %c0_i32_2 = arith.constant 0 : i32
    return %c0_i32, %c0_i32_0, %c0_i32_1 : i32, i32, i32
  }
  func.func @transform_8(%arg0: i32) -> (i32, i32, i32) {
    %c0_i32 = arith.constant 0 : i32
    %c0_i32_0 = arith.constant 0 : i32
    %c0_i32_1 = arith.constant 0 : i32
    %c0_i32_2 = arith.constant 0 : i32
    return %c0_i32, %c0_i32_0, %c0_i32_1 : i32, i32, i32
  }
  func.func @transform_9(%arg0: i32) -> (i32, i32, i32) {
    %c0_i32 = arith.constant 0 : i32
    %c0_i32_0 = arith.constant 0 : i32
    %c0_i32_1 = arith.constant 0 : i32
    %c0_i32_2 = arith.constant 0 : i32
    return %c0_i32, %c0_i32_0, %c0_i32_1 : i32, i32, i32
  }
  func.func @transform_10(%arg0: i32) -> (i32, i32) {
    %c0_i32 = arith.constant 0 : i32
    %c0_i32_0 = arith.constant 0 : i32
    %c0_i32_1 = arith.constant 0 : i32
    return %c0_i32, %c0_i32_0 : i32, i32
  }
  func.func @transform_11(%arg0: i32) -> (i32, i32) {
    %c0_i32 = arith.constant 0 : i32
    %c0_i32_0 = arith.constant 0 : i32
    %c0_i32_1 = arith.constant 0 : i32
    return %c0_i32, %c0_i32_0 : i32, i32
  }
  func.func @transform_12(%arg0: i32) -> (i32, i32) {
    %c0_i32 = arith.constant 0 : i32
    %c0_i32_0 = arith.constant 0 : i32
    %c0_i32_1 = arith.constant 0 : i32
    return %c0_i32, %c0_i32_0 : i32, i32
  }
  func.func @transform_13(%arg0: i32) -> (i32, i32) {
    %c0_i32 = arith.constant 0 : i32
    %c0_i32_0 = arith.constant 0 : i32
    %c0_i32_1 = arith.constant 0 : i32
    return %c0_i32, %c0_i32_0 : i32, i32
  }
  func.func @transform_14(%arg0: i32) -> (i32, i32) {
    %c0_i32 = arith.constant 0 : i32
    %c0_i32_0 = arith.constant 0 : i32
    %c0_i32_1 = arith.constant 0 : i32
    return %c0_i32, %c0_i32_0 : i32, i32
  }
  func.func @transform_15(%arg0: i32) -> (i32, i32) {
    %c0_i32 = arith.constant 0 : i32
    %c0_i32_0 = arith.constant 0 : i32
    return %arg0, %c0_i32 : i32, i32
  }
}

</mosaic_0001>

<bundles_post_ra>
// kernel: tpu_custom_call.1
= control target key start
LH: loop header
LB: loop body
LE: loop exit
PB: predicated region body
PF: predicated region fallthrough
CT: control target
= control target key end

     0   :  { %20 = vsyncpa [#allocation3], 0  ;;  %s2701_s0 = inlined_call_operand.hbm [shape: f32[8,32], index: 0, kind: input, shape index: {}]   ;;  %s2702_s1 = inlined_call_operand.hbm [shape: f32[8,32], index: 1, kind: input, shape index: {}]   ;;  %s2703_s2 = inlined_call_operand.hbm [shape: f32[8,32], index: 2, kind: input, shape index: {}]   ;;  %s2704_s3 = inlined_call_operand.hbm [shape: f32[8,32], index: 3, kind: input, shape index: {}]   ;;  %s2705_s4 = inlined_call_operand.hbm [shape: f32[4,32,32], index: 4, kind: input, shape index: {}]   ;;  %s2706_s5 = inlined_call_operand.hbm [shape: f32[4,1,32], index: 5, kind: input, shape index: {}]   ;;  %s2707_s6 = inlined_call_operand.vmem [shape: f32[4,32,128], index: 6, kind: input, shape index: {}]   ;;  %s2708_s7 = inlined_call_operand.vmem [shape: f32[4,1,128], index: 7, kind: input, shape index: {}]   ;;  %s2709_s8 = inlined_call_operand.hbm [shape: f32[4,32,128], index: 8, kind: input, shape index: {}]   ;;  %s2710_s9 = inlined_call_operand.vmem [shape: f32[4,1,128], index: 9, kind: input, shape index: {}]   ;;  %s2711_s10 = inlined_call_operand.hbm [shape: f32[32,128], index: 10, kind: input, shape index: {}]   ;;  %s2712_s11 = inlined_call_operand.vmem [shape: f32[1,128], index: 11, kind: input, shape index: {}]   ;;  %s2713_s12 = inlined_call_operand.hbm [shape: f32[100,100], index: 12, kind: input, shape index: {}]   ;;  %s2714_s13 = inlined_call_operand.vmem [shape: f32[100,16], index: 13, kind: input, shape index: {}]   ;;  %s2715_s14 = inlined_call_operand.vmem [shape: f32[1,16], index: 14, kind: input, shape index: {}]   ;;  %s2716_s15 = inlined_call_operand.hbm [shape: f32[8,128], index: 15, kind: output, shape index: {}]  }
   0x1   :  { %21 = vsyncpa [#allocation6], 0 }
   0x2   :  { %22 = vsyncpa [#allocation9], 0 }
   0x3   :  { %23 = vsyncpa [#allocation12], 0 }
   0x4   :  { %24 = vsyncpa [#allocation15], 0 }
   0x5   :  { %25 = vsyncpa [#allocation4], 0  ;;  %s2255_s18 = smov [#allocation5]   ;;  %s2256_s20 = smov [#allocation8]  }
   0x6   :  { %s42_s19 = sshll.u32 %s2255_s18, 4  ;;  %s62_s21 = sshll.u32 %s2256_s20, 4  ;;  %s43_s19 = int_to_ptr.vmem [resolvable:$true] %s42_s19  ;;  %s63_s21 = int_to_ptr.vmem [resolvable:$true] %s62_s21 }
   0x7   :  { %s2051_s22 = scalar_lea.vmem %s43_s19, 128  ;;  %p2056_p1 = scmp.lt.s32.totalorder %s43_s19, %s43_s19 }
   0x8   :  { %p2052_p0 = scmp.ne.s32.totalorder %s43_s19, %s2051_s22  ;;  %p2057_p2 = scmp.lt.s32.totalorder %s2051_s22, %s2051_s22 }
   0xa   :  { %p2058_p3 = por %p2057_p2, %p2056_p1 }
   0xc   :  { %p2059_p4 = pnand %p2058_p3, %p2052_p0 }
   0xe   :  { %2062 = shalt.err (!%p2059_p4)
}
   0xf   :  { %45 = dma.hbm_to_vmem [thread:$0]  %s2702_s1, 128, %s43_s19, [#allocation6]  }
  0x10   :  { %s2071_s25 = scalar_lea.vmem %s63_s21, 128  ;;  %p2076_p6 = scmp.lt.s32.totalorder %s63_s21, %s63_s21 }
  0x11   :  { %p2072_p5 = scmp.ne.s32.totalorder %s63_s21, %s2071_s25  ;;  %p2077_p7 = scmp.lt.s32.totalorder %s2071_s25, %s2071_s25 }
  0x13   :  { %p2078_p8 = por %p2077_p7, %p2076_p6 }
  0x15   :  { %p2079_p9 = pnand %p2078_p8, %p2072_p5 }
  0x17   :  { %2082 = shalt.err (!%p2079_p9)
}
  0x18   :  { %65 = dma.hbm_to_vmem [thread:$0]  %s2704_s3, 128, %s63_s21, [#allocation9]  }
  0x19   :  { %s2257_s28 = smov [#allocation11]  }
  0x1a   :  { %s83_s29 = sshll.u32 %s2257_s28, 4  ;;  %s84_s29 = int_to_ptr.vmem [resolvable:$true] %s83_s29 }
  0x1b   :  { %s2091_s30 = scalar_lea.vmem %s84_s29, 64  ;;  %p2096_p11 = scmp.lt.s32.totalorder %s84_s29, %s84_s29 }
  0x1c   :  { %p2092_p10 = scmp.ne.s32.totalorder %s84_s29, %s2091_s30  ;;  %p2097_p12 = scmp.lt.s32.totalorder %s2091_s30, %s2091_s30 }
  0x1e   :  { %p2098_p13 = por %p2097_p12, %p2096_p11 }
  0x20   :  { %p2099_p0 = pnand %p2098_p13, %p2092_p10 }
  0x22   :  { %2102 = shalt.err (!%p2099_p0)
}
  0x23   :  { %s2258_s1 = smov 16   ;;  %s2259_s16 = smov 1  }
  0x24   :  { %89 = dma.hbm_to_vmem [thread:$0]  %s2706_s5, 64, %s84_s29, [#allocation12], %s2258_s1, %s2258_s1, %s2259_s16  }
  0x25   :  { %s2260_s19 = smov [#allocation14]   ;;  %s2261_s3 = smov [#allocation2]  }
  0x26   :  { %s113_s20 = sshll.u32 %s2260_s19, 4  ;;  %s32_s21 = sshll.u32 %s2261_s3, 4  ;;  %s114_s20 = int_to_ptr.vmem [resolvable:$true] %s113_s20  ;;  %s33_s21 = int_to_ptr.vmem [resolvable:$true] %s32_s21 }
  0x27   :  { %s2111_s22 = scalar_lea.vmem %s114_s20, 512  ;;  %p2116_p2 = scmp.lt.s32.totalorder %s114_s20, %s114_s20 }
  0x28   :  { %p2112_p1 = scmp.ne.s32.totalorder %s114_s20, %s2111_s22  ;;  %p2117_p3 = scmp.lt.s32.totalorder %s2111_s22, %s2111_s22 }
  0x2a   :  { %p2118_p4 = por %p2117_p3, %p2116_p2 }
  0x2c   :  { %p2119_p5 = pnand %p2118_p4, %p2112_p1 }
  0x2e   :  { %2122 = shalt.err (!%p2119_p5)
}
  0x2f   :  { %s2262_s23 = smov 128   ;;  %s2263_s24 = smov 8  }
  0x30   :  { %119 = dma.hbm_to_vmem [thread:$0]  %s2711_s10, 512, %s114_s20, [#allocation15], %s2262_s23, %s2262_s23, %s2263_s24  }
  0x31   :  { %s2131_s5 = scalar_lea.vmem %s33_s21, 128  ;;  %p2136_p7 = scmp.lt.s32.totalorder %s33_s21, %s33_s21 }
  0x32   :  { %p2132_p6 = scmp.ne.s32.totalorder %s33_s21, %s2131_s5  ;;  %p2137_p8 = scmp.lt.s32.totalorder %s2131_s5, %s2131_s5 }
  0x34   :  { %p2138_p9 = por %p2137_p8, %p2136_p7 }
  0x36   :  { %p2139_p10 = pnand %p2138_p9, %p2132_p6 }
  0x38   :  { %2142 = shalt.err (!%p2139_p10)
}
  0x39   :  { %35 = dma.hbm_to_vmem [thread:$0]  %s2701_s0, 128, %s33_s21, [#allocation3]  }
  0x3a   :  { %s2264_s29 = smov [#allocation7]   ;;  %s2265_s1 = smov [#allocation10]  }
  0x3b   :  { %s52_s30 = sshll.u32 %s2264_s29, 4  ;;  %s71_s16 = sshll.u32 %s2265_s1, 4  ;;  %s53_s30 = int_to_ptr.vmem [resolvable:$true] %s52_s30  ;;  %s72_s16 = int_to_ptr.vmem [resolvable:$true] %s71_s16 }
  0x3c   :  { %s2151_s17 = scalar_lea.vmem %s53_s30, 128  ;;  %p2156_p12 = scmp.lt.s32.totalorder %s53_s30, %s53_s30 }
  0x3d   :  { %p2152_p11 = scmp.ne.s32.totalorder %s53_s30, %s2151_s17  ;;  %p2157_p13 = scmp.lt.s32.totalorder %s2151_s17, %s2151_s17 }
  0x3f   :  { %p2158_p0 = por %p2157_p13, %p2156_p12 }
  0x41   :  { %p2159_p1 = pnand %p2158_p0, %p2152_p11 }
  0x43   :  { %2162 = shalt.err (!%p2159_p1)
}
  0x44   :  { %55 = dma.hbm_to_vmem [thread:$0]  %s2703_s2, 128, %s53_s30, [#allocation6]  }
  0x45   :  { %s2171_s19 = scalar_lea.vmem %s72_s16, 2048  ;;  %p2176_p3 = scmp.lt.s32.totalorder %s72_s16, %s72_s16 }
  0x46   :  { %p2172_p2 = scmp.ne.s32.totalorder %s72_s16, %s2171_s19  ;;  %p2177_p4 = scmp.lt.s32.totalorder %s2171_s19, %s2171_s19 }
  0x48   :  { %p2178_p5 = por %p2177_p4, %p2176_p3 }
  0x4a   :  { %p2179_p6 = pnand %p2178_p5, %p2172_p2 }
  0x4c   :  { %2182 = shalt.err (!%p2179_p6)
}
  0x4d   :  { %77 = dma.hbm_to_vmem [thread:$0]  %s2705_s4, 2048, %s72_s16, [#allocation9], %s2262_s23, %s2262_s23, %s2263_s24  }
  0x4e   :  { %s2266_s3 = smov [#allocation13]   ;;  %s2267_s22 = smov [#allocation16]  }
  0x4f   :  { %s99_s21 = sshll.u32 %s2266_s3, 4  ;;  %s127_s2 = sshll.u32 %s2267_s22, 4  ;;  %s100_s21 = int_to_ptr.vmem [resolvable:$true] %s99_s21  ;;  %s128_s2 = int_to_ptr.vmem [resolvable:$true] %s127_s2 }
  0x50   :  { %s2191_s25 = scalar_lea.vmem %s100_s21, 2048  ;;  %p2196_p8 = scmp.lt.s32.totalorder %s100_s21, %s100_s21 }
  0x51   :  { %p2192_p7 = scmp.ne.s32.totalorder %s100_s21, %s2191_s25  ;;  %p2197_p9 = scmp.lt.s32.totalorder %s2191_s25, %s2191_s25 }
  0x53   :  { %p2198_p10 = por %p2197_p9, %p2196_p8 }
  0x55   :  { %p2199_p11 = pnand %p2198_p10, %p2192_p7 }
  0x57   :  { %2202 = shalt.err (!%p2199_p11)
}
  0x58   :  { %105 = dma.hbm_to_vmem [thread:$0]  %s2709_s8, 2048, %s100_s21, [#allocation12], %s2262_s23, %s2262_s23, %s2263_s24  }
  0x59   :  { %s2211_s4 = scalar_lea.vmem %s128_s2, 1664  ;;  %p2216_p13 = scmp.lt.s32.totalorder %s128_s2, %s128_s2 }
  0x5a   :  { %p2212_p12 = scmp.ne.s32.totalorder %s128_s2, %s2211_s4  ;;  %p2217_p0 = scmp.lt.s32.totalorder %s2211_s4, %s2211_s4 }
  0x5c   :  { %p2218_p1 = por %p2217_p0, %p2216_p13 }
  0x5e   :  { %p2219_p2 = pnand %p2218_p1, %p2212_p12 }
  0x60   :  { %2222 = shalt.err (!%p2219_p2)
}
  0x61   :  { %133 = dma.hbm_to_vmem [thread:$0]  %s2713_s12, 1664, %s128_s2, [#allocation15], %s2262_s23, %s2262_s23, %s2263_s24  }
  0x62   :  { %2243 = dma.done.wait [#allocation3], 128  }
  0x63   :  { %2244 = vsyncadd [#allocation3], 4294967168 }
  0x64   :  { %2245 = dma.done.wait [#allocation6], 256  }
  0x65   :  { %2246 = vsyncadd [#allocation6], 4294967040 }
  0x66   :  { %2247 = dma.done.wait [#allocation9], 2176  }
  0x67   :  { %2248 = vsyncadd [#allocation9], 4294965120 }
  0x68   :  { %2249 = dma.done.wait [#allocation12], 2112  }
  0x69   :  { %2250 = vsyncadd [#allocation12], 4294965184 }
  0x6a   :  { %2251 = dma.done.wait [#allocation15], 2176  }
  0x6b   :  { %2252 = vsyncadd [#allocation15], 4294965120  ;;  %v2268_v0 = vmov 0.0   ;;  %vm2269_vm0 = vmmov 0   ;;  %v169_v1 = vld [vmem:[#allocation10 + $0x18] sm:$0xff]  ;;  %v168_v2 = vld [vmem:[#allocation10 + $0x10] sm:$0xff] }
  0x6c   :  { %1790 = vmatprep.subr.mxu0 %v2268_v0  ;;  %1801 = vmatprep.subr.mxu1 %v2268_v0  ;;  %v256_v3 = vld [vmem:[#allocation10 + $0x38] sm:$0xff]  ;;  %v167_v4 = vld [vmem:[#allocation10 + $0x8] sm:$0xff]  ;;  %v255_v5 = vld [vmem:[#allocation10 + $0x30] sm:$0xff]  ;;  %vm177_vm1 = vcmask 261120   ;;  %s2270_s28 = smov 98   ;;  %s2273_s8 = smov 108  }
  0x6d   :  { %1798 = vmatprep.mubr.msk.f32.mxu0 %vm2269_vm0, %v2268_v0  ;;  %1809 = vmatprep.mubr.msk.f32.mxu1 %vm2269_vm0, %v2268_v0  ;;  %v254_v6 = vld [vmem:[#allocation10 + $0x28] sm:$0xff]  ;;  %v166_v7 = vld [vmem:[#allocation10] sm:$0xff]  ;;  %v343_v11 = vld [vmem:[#allocation10 + $0x58] sm:$0xff]  ;;  %s2274_s12 = smov 68   ;;  %s2275_s23 = smov 78   ;;  %vm1375_vm2 = vcmask 1043456  }
  0x6e   :  { %1791 = vmatpush3.msra.mxu0 %v169_v1  ;;  %1802 = vmatpush3.msra.mxu1 %v256_v3  ;;  %v165_v8 = vld [vmem:[#allocation2] sm:$0xff]  ;;  %v251_v10 = vld [vmem:[#allocation5] sm:$0xff]  ;;  %v342_v12 = vld [vmem:[#allocation10 + $0x50] sm:$0xff]  ;;  %s2276_s24 = smov 48   ;;  %s2277_s29 = smov 58   ;;  %vm1337_vm3 = vcmask 80896  }
  0x6f   :  { %1792 = vmatprep.subr.mxu0 %v2268_v0  ;;  %1803 = vmatprep.subr.mxu1 %v2268_v0  ;;  %v253_v9 = vld [vmem:[#allocation10 + $0x20] sm:$0xff]  ;;  %v430_v13 = vld [vmem:[#allocation10 + $0x78] sm:$0xff]  ;;  %v341_v14 = vld [vmem:[#allocation10 + $0x48] sm:$0xff]  ;;  %s2278_s30 = smov 38   ;;  %s2279_s1 = smov 20   ;;  %vm1339_vm4 = vcmask 162816  }
  0x70   :  { %1793 = vmatpush3.msra.mxu0 %v168_v2  ;;  %1804 = vmatpush3.msra.mxu1 %v255_v5  ;;  %v429_v15 = vld [vmem:[#allocation10 + $0x70] sm:$0xff]  ;;  %v340_v16 = vld [vmem:[#allocation10 + $0x40] sm:$0xff]  ;;  %v428_v17 = vld [vmem:[#allocation10 + $0x68] sm:$0xff]  ;;  %s2280_s16 = smov 10   ;;  %s2282_s17 = smov 30   ;;  %vm1341_vm5 = vcmask 244736  }
  0x71   :  { %1794 = vmatprep.subr.mxu0 %v2268_v0  ;;  %1805 = vmatprep.subr.mxu1 %v2268_v0  ;;  %v338_v18 = vld [vmem:[#allocation7] sm:$0xff]  ;;  %v427_v19 = vld [vmem:[#allocation10 + $0x60] sm:$0xff]  ;;  %v425_v20 = vld [vmem:[#allocation8] sm:$0xff]  ;;  %s2283_s10 = smov 60   ;;  %s2284_s18 = smov 50   ;;  %vm1343_vm6 = vcmask 326656  }
  0x72   :  { %1795 = vmatpush3.msra.mxu0 %v167_v4  ;;  %1806 = vmatpush3.msra.mxu1 %v254_v6  ;;  %v515_v21 = vld [vmem:[%s2707_s6 + $0x18] sm:$0xff]  ;;  %v514_v23 = vld [vmem:[%s2707_s6 + $0x10] sm:$0xff]  ;;  %v513_v25 = vld [vmem:[%s2707_s6 + $0x8] sm:$0xff]  ;;  %s2285_s19 = smov 80   ;;  %s2286_s0 = smov 70   ;;  %vm1345_vm7 = vcmask 408576  }
  0x73   :  { %1796 = vmatprep.subr.mxu0 %v2268_v0  ;;  %1807 = vmatprep.subr.mxu1 %v2268_v0  ;;  %v599_v22 = vld [vmem:[#allocation13 + $0x18] sm:$0xff]  ;;  %v598_v24 = vld [vmem:[#allocation13 + $0x10] sm:$0xff]  ;;  %v597_v26 = vld [vmem:[#allocation13 + $0x8] sm:$0xff]  ;;  %s2287_s20 = smov 90   ;;  %vm1347_vm8 = vcmask 490496   ;;  %vm1349_vm9 = vcmask 572416  }
  0x74   :  { %1797 = vmatpush3.msra.mxu0 %v166_v7  ;;  %1808 = vmatpush3.msra.mxu1 %v253_v9  ;;  %v512_v27 = vld [vmem:[%s2707_s6] sm:$0xff]  ;;  %v1663_v32 = vld [vmem:[%s2707_s6 + $0x38] sm:$0xff]  ;;  %v1662_v36 = vld [vmem:[%s2707_s6 + $0x30] sm:$0xff]  ;;  %vm1351_vm10 = vcmask 654336   ;;  %vm1353_vm11 = vcmask 736256   ;;  %vm1371_vm12 = vcmask 818176  }
  0x75   :  { %1799 = vmatmul.mubr.msk.f32.vlgmr.msra.gmra.mxu0 %vm177_vm1, %v165_v8  ;;  %1810 = vmatmul.mubr.msk.f32.vlgmr.msra.gmra.mxu1 %vm177_vm1, %v251_v10  ;;  %v596_v28 = vld [vmem:[#allocation13] sm:$0xff]  ;;  %v1648_v29 = vld [vmem:[#allocation11] ss:$0 sm:$0xff]  ;;  %v767_v37 = vld [vmem:[#allocation13 + $0x30] sm:$0xff]  ;;  %vm1553_vm13 = vcmask 64544   ;;  %vm1548_vm14 = vcmask 31744  }
  0x76   :  { %1812 = vmatprep.subr.mxu0 %v2268_v0  ;;  %1820 = vmatprep.mubr.msk.f32.mxu0 %vm2269_vm0, %v2268_v0  ;;  %v768_v33 = vld [vmem:[#allocation13 + $0x38] sm:$0xff]  ;;  %v1661_v40 = vld [vmem:[%s2707_s6 + $0x28] sm:$0xff]  ;;  %v1672_v50 = vld [vmem:[%s2707_s6 + $0x50] sm:$0xff]  ;;  %vm1558_vm15 = vcmask 97344   ;;  %s2290_s22 = smov 116   ;;  %s2291_s2 = smov 100  }
  0x77   :  { %1813 = vmatpush3.msra.mxu0 %v343_v11  ;;  %1823 = vmatprep.subr.mxu1 %v2268_v0  ;;  %v1650_v39 = vld [vmem:[#allocation11 + $0x1] ss:$0 sm:$0xff]  ;;  %v766_v41 = vld [vmem:[#allocation13 + $0x28] sm:$0xff]  ;;  %v765_v44 = vld [vmem:[#allocation13 + $0x20] sm:$0xff]  ;;  %s2292_s25 = smov [#allocation17]  }
  0x78   :  { %1814 = vmatprep.subr.mxu0 %v2268_v0  ;;  %1824 = vmatpush3.msra.mxu1 %v430_v13  ;;  %v1660_v42 = vld [vmem:[%s2707_s6 + $0x20] sm:$0xff]  ;;  %v1673_v46 = vld [vmem:[%s2707_s6 + $0x58] sm:$0xff]  ;;  %v1671_v54 = vld [vmem:[%s2707_s6 + $0x48] sm:$0xff]  ;;  %s1635_s26 = sshll.u32 %s2292_s25, 4  ;;  %s1636_s26 = int_to_ptr.vmem [resolvable:$true] %s1635_s26 }
  0x79   :  { %1815 = vmatpush3.msra.mxu0 %v342_v12  ;;  %1825 = vmatprep.subr.mxu1 %v2268_v0  ;;  %v939_v47 = vld [vmem:[#allocation13 + $0x58] sm:$0xff]  ;;  %v938_v51 = vld [vmem:[#allocation13 + $0x50] sm:$0xff]  ;;  %v937_v55 = vld [vmem:[#allocation13 + $0x48] sm:$0xff]  ;;  %s2223_s5 = scalar_lea.vmem %s1636_s26, 128  ;;  %p2228_p4 = scmp.lt.s32.totalorder %s1636_s26, %s1636_s26 }
  0x7a   :  { %1816 = vmatprep.subr.mxu0 %v2268_v0  ;;  %1826 = vmatpush3.msra.mxu1 %v429_v15  ;;  %v1652_v53 = vld [vmem:[#allocation11 + $0x2] ss:$0 sm:$0xff]  ;;  %v936_v58 = vld [vmem:[#allocation13 + $0x40] sm:$0xff]  ;;  %v1683_v59 = vld [vmem:[%s2707_s6 + $0x78] sm:$0xff]  ;;  %p2224_p3 = scmp.ne.s32.totalorder %s1636_s26, %s2223_s5  ;;  %p2229_p5 = scmp.lt.s32.totalorder %s2223_s5, %s2223_s5 }
  0x7b   :  { %1817 = vmatpush3.msra.mxu0 %v341_v14  ;;  %1827 = vmatprep.subr.mxu1 %v2268_v0  ;;  %v1670_v56 = vld [vmem:[%s2707_s6 + $0x40] sm:$0xff]  ;;  %v1682_v61 = vld [vmem:[%s2707_s6 + $0x70] sm:$0xff]  ;;  %v1681_v1 = vld [vmem:[%s2707_s6 + $0x68] sm:$0xff] }
  0x7c   :  { %1818 = vmatprep.subr.mxu0 %v2268_v0  ;;  %1828 = vmatpush3.msra.mxu1 %v428_v17  ;;  %v1110_v60 = vld [vmem:[#allocation13 + $0x78] sm:$0xff]  ;;  %v1109_v62 = vld [vmem:[#allocation13 + $0x70] sm:$0xff]  ;;  %v1108_v2 = vld [vmem:[#allocation13 + $0x68] sm:$0xff]  ;;  %p2230_p6 = por %p2229_p5, %p2228_p4 }
  0x7d   :  { %1819 = vmatpush3.msra.mxu0 %v340_v16  ;;  %1829 = vmatprep.subr.mxu1 %v2268_v0  ;;  %v1654_v63 = vld [vmem:[#allocation11 + $0x3] ss:$0 sm:$0xff]  ;;  %v1107_v5 = vld [vmem:[#allocation13 + $0x60] sm:$0xff]  ;;  %v1193_v7 = vld [vmem:[#allocation14 + $0x10] sm:$0xff] }
  0x7e   :  { %1821 = vmatmul.mubr.msk.f32.vlgmr.msra.gmra.mxu0 %vm177_vm1, %v338_v18  ;;  %1830 = vmatpush3.msra.mxu1 %v427_v19  ;;  %v1680_v3 = vld [vmem:[%s2707_s6 + $0x60] sm:$0xff]  ;;  %v1192_v8 = vld [vmem:[#allocation14 + $0x8] sm:$0xff]  ;;  %s2281_s6 = smov 40   ;;  %p2231_p7 = pnand %p2230_p6, %p2224_p3 }
  0x7f   :  { %1831 = vmatprep.mubr.msk.f32.mxu1 %vm2269_vm0, %v2268_v0  ;;  %1834 = vmatprep.subr.mxu0 %v2268_v0  ;;  %v1194_v6 = vld [vmem:[#allocation14 + $0x18] sm:$0xff]  ;;  %v1191_v9 = vld [vmem:[#allocation14] sm:$0xff] }
  0x80   :  { %1832 = vmatmul.mubr.msk.f32.vlgmr.msra.gmra.mxu1 %vm177_vm1, %v425_v20  ;;  %1845 = vmatprep.subr.mxu1 %v2268_v0  ;;  %v1665_v18 = vld [vmem:[%s2708_s7 + $0x1] ss:$0 sm:$0xff] }
  0x81   :  { %1835 = vmatpush3.msra.mxu0 %v515_v21  ;;  %1846 = vmatpush3.msra.mxu1 %v599_v22  ;;  %v1668_v19 = vld [vmem:[%s2710_s9 + $0x1] ss:$0 sm:$0xff]  ;;  %v1656_v22 = vld [vmem:[%s2708_s7] ss:$0 sm:$0xff] }
  0x82   :  { %1836 = vmatprep.subr.mxu0 %v2268_v0  ;;  %1847 = vmatprep.subr.mxu1 %v2268_v0 }
  0x83   :  { %1837 = vmatpush3.msra.mxu0 %v514_v23  ;;  %1848 = vmatpush3.msra.mxu1 %v598_v24  ;;  %v1658_v23 = vld [vmem:[%s2710_s9] ss:$0 sm:$0xff]  ;;  %v1675_v24 = vld [vmem:[%s2708_s7 + $0x2] ss:$0 sm:$0xff] }
  0x84   :  { %1838 = vmatprep.subr.mxu0 %v2268_v0  ;;  %1849 = vmatprep.subr.mxu1 %v2268_v0 }
  0x85   :  { %1839 = vmatpush3.msra.mxu0 %v513_v25  ;;  %1850 = vmatpush3.msra.mxu1 %v597_v26  ;;  %v1678_v25 = vld [vmem:[%s2710_s9 + $0x2] ss:$0 sm:$0xff] }
  0x86   :  { %1840 = vmatprep.subr.mxu0 %v2268_v0  ;;  %1851 = vmatprep.subr.mxu1 %v2268_v0 }
  0x87   :  { %1842 = vmatprep.mubr.msk.f32.mxu0 %vm2269_vm0, %v2268_v0  ;;  %1853 = vmatprep.mubr.msk.f32.mxu1 %vm2269_vm0, %v2268_v0 }
  0x88   :  { %1841 = vmatpush3.msra.mxu0 %v512_v27  ;;  %1852 = vmatpush3.msra.mxu1 %v596_v28 }
  0x89   :  { %1856 = vmatprep.subr.mxu0 %v2268_v0  ;;  %1867 = vmatprep.subr.mxu1 %v2268_v0 }
 0x135   :  { %v247_v30 = vpop.f32.mrf.mxu0  ;;  %v334_v34 = vpop.f32.mrf.mxu1 }
 0x136   :  { %v2466_v31 = vadd.f32 %v1648_v29, %v247_v30  ;;  %v335_v43 = vadd.f32 %v1650_v39, %v334_v34 }
 0x137   :  { %v1800_v35 = vpop.f32.mrf.mxu0  ;;  %v1811_v38 = vpop.f32.mrf.mxu1 }
 0x138   :  { %1843 = vmatmul.mubr.msk.f32.vlgmr.msra.gmra.mxu0 %vm177_vm1, %v2466_v31  ;;  %1854 = vmatmul.mubr.msk.f32.vlgmr.msra.gmra.mxu1 %vm177_vm1, %v2466_v31  ;;  %v1685_v35 = vld [vmem:[%s2708_s7 + $0x3] ss:$0 sm:$0xff]  ;;  %s2271_s7 = smov 118  }
 0x139   :  { %1857 = vmatpush3.msra.mxu0 %v1663_v32  ;;  %1868 = vmatpush3.msra.mxu1 %v768_v33 }
 0x13a   :  { %1858 = vmatprep.subr.mxu0 %v2268_v0  ;;  %1869 = vmatprep.subr.mxu1 %v2268_v0 }
 0x13b   :  { %1859 = vmatpush3.msra.mxu0 %v1662_v36  ;;  %1870 = vmatpush3.msra.mxu1 %v767_v37  ;;  %v1688_v36 = vld [vmem:[%s2710_s9 + $0x3] ss:$0 sm:$0xff]  ;;  %s2272_s9 = smov 88  }
 0x13c   :  { %1860 = vmatprep.subr.mxu0 %v2268_v0  ;;  %1871 = vmatprep.subr.mxu1 %v2268_v0 }
 0x13d   :  { %1861 = vmatpush3.msra.mxu0 %v1661_v40  ;;  %1872 = vmatpush3.msra.mxu1 %v766_v41 }
 0x13e   :  { %1862 = vmatprep.subr.mxu0 %v2268_v0  ;;  %1873 = vmatprep.subr.mxu1 %v2268_v0  ;;  %v421_v45 = vpop.f32.mrf.mxu0 }
 0x13f   :  { %1863 = vmatpush3.msra.mxu0 %v1660_v42  ;;  %1864 = vmatprep.mubr.msk.f32.mxu0 %vm2269_vm0, %v2268_v0  ;;  %v422_v57 = vadd.f32 %v1652_v53, %v421_v45 }
 0x140   :  { %1874 = vmatpush3.msra.mxu1 %v765_v44  ;;  %1875 = vmatprep.mubr.msk.f32.mxu1 %vm2269_vm0, %v2268_v0  ;;  %v1822_v48 = vpop.f32.mrf.mxu0  ;;  %v508_v49 = vpop.f32.mrf.mxu1 }
 0x141   :  { %1865 = vmatmul.mubr.msk.f32.vlgmr.msra.gmra.mxu0 %vm177_vm1, %v335_v43  ;;  %1876 = vmatmul.mubr.msk.f32.vlgmr.msra.gmra.mxu1 %vm177_vm1, %v335_v43  ;;  %v509_v4 = vadd.f32 %v1654_v63, %v508_v49 }
 0x142   :  { %1878 = vmatprep.subr.mxu0 %v2268_v0  ;;  %1889 = vmatprep.subr.mxu1 %v2268_v0  ;;  %v1833_v52 = vpop.f32.mrf.mxu1 }
 0x143   :  { %1879 = vmatpush3.msra.mxu0 %v1673_v46  ;;  %1890 = vmatpush3.msra.mxu1 %v939_v47 }
 0x144   :  { %1880 = vmatprep.subr.mxu0 %v2268_v0  ;;  %1891 = vmatprep.subr.mxu1 %v2268_v0 }
 0x145   :  { %1881 = vmatpush3.msra.mxu0 %v1672_v50  ;;  %1892 = vmatpush3.msra.mxu1 %v938_v51 }
 0x146   :  { %1882 = vmatprep.subr.mxu0 %v2268_v0  ;;  %1893 = vmatprep.subr.mxu1 %v2268_v0 }
 0x147   :  { %1883 = vmatpush3.msra.mxu0 %v1671_v54  ;;  %1894 = vmatpush3.msra.mxu1 %v937_v55 }
 0x148   :  { %1884 = vmatprep.subr.mxu0 %v2268_v0  ;;  %1895 = vmatprep.subr.mxu1 %v2268_v0 }
 0x149   :  { %1885 = vmatpush3.msra.mxu0 %v1670_v56  ;;  %1886 = vmatprep.mubr.msk.f32.mxu0 %vm2269_vm0, %v2268_v0 }
 0x14a   :  { %1896 = vmatpush3.msra.mxu1 %v936_v58  ;;  %1897 = vmatprep.mubr.msk.f32.mxu1 %vm2269_vm0, %v2268_v0 }
 0x14b   :  { %1887 = vmatmul.mubr.msk.f32.vlgmr.msra.gmra.mxu0 %vm177_vm1, %v422_v57  ;;  %1898 = vmatmul.mubr.msk.f32.vlgmr.msra.gmra.mxu1 %vm177_vm1, %v422_v57 }
 0x14c   :  { %1900 = vmatprep.subr.mxu0 %v2268_v0  ;;  %1911 = vmatprep.subr.mxu1 %v2268_v0 }
 0x14d   :  { %1901 = vmatpush3.msra.mxu0 %v1683_v59  ;;  %1912 = vmatpush3.msra.mxu1 %v1110_v60 }
 0x14e   :  { %1902 = vmatprep.subr.mxu0 %v2268_v0  ;;  %1913 = vmatprep.subr.mxu1 %v2268_v0 }
 0x14f   :  { %1903 = vmatpush3.msra.mxu0 %v1682_v61  ;;  %1914 = vmatpush3.msra.mxu1 %v1109_v62 }
 0x150   :  { %1904 = vmatprep.subr.mxu0 %v2268_v0  ;;  %1915 = vmatprep.subr.mxu1 %v2268_v0 }
 0x151   :  { %1905 = vmatpush3.msra.mxu0 %v1681_v1  ;;  %1916 = vmatpush3.msra.mxu1 %v1108_v2 }
 0x152   :  { %1906 = vmatprep.subr.mxu0 %v2268_v0  ;;  %1917 = vmatprep.subr.mxu1 %v2268_v0 }
 0x153   :  { %1907 = vmatpush3.msra.mxu0 %v1680_v3  ;;  %1908 = vmatprep.mubr.msk.f32.mxu0 %vm2269_vm0, %v2268_v0  ;;  %v1370_v3 = vld [vmem:[#allocation16 + $0x60] sm:$0xf] }
 0x154   :  { %1918 = vmatpush3.msra.mxu1 %v1107_v5  ;;  %1919 = vmatprep.mubr.msk.f32.mxu1 %vm2269_vm0, %v2268_v0 }
 0x155   :  { %1909 = vmatmul.mubr.msk.f32.vlgmr.msra.gmra.mxu0 %vm177_vm1, %v509_v4  ;;  %1920 = vmatmul.mubr.msk.f32.vlgmr.msra.gmra.mxu1 %vm177_vm1, %v509_v4 }
 0x156   :  { %1922 = vmatprep.subr.mxu0 %v2268_v0  ;;  %1930 = vmatprep.mubr.msk.f32.mxu0 %vm2269_vm0, %v2268_v0 }
 0x157   :  { %1923 = vmatpush3.msra.mxu0 %v1194_v6  ;;  %1933 = vmatprep.subr.mxu1 %v2268_v0 }
 0x158   :  { %1924 = vmatprep.subr.mxu0 %v2268_v0  ;;  %1959 = vmatprep.mubr.msk.f32.mxu1 %vm2269_vm0, %v2268_v0 }
 0x159   :  { %1925 = vmatpush3.msra.mxu0 %v1193_v7  ;;  %1934 = vmatpush3.msk.msra.mxu1 %vm1375_vm2, %v1370_v3  ;;  %v1369_v7 = vld [vmem:[#allocation16 + $0x58] sm:$0xff] }
 0x15a   :  { %1926 = vmatprep.subr.mxu0 %v2268_v0  ;;  %1935 = vmatprep.subr.mxu1 %v2268_v0 }
 0x15b   :  { %1927 = vmatpush3.msra.mxu0 %v1192_v8  ;;  %v1368_v8 = vld [vmem:[#allocation16 + $0x50] sm:$0xff]  ;;  %1936 = vmatpush3.msra.mxu1 %v1369_v7 }
 0x15c   :  { %1928 = vmatprep.subr.mxu0 %v2268_v0  ;;  %1937 = vmatprep.subr.mxu1 %v2268_v0 }
 0x15d   :  { %1929 = vmatpush3.msra.mxu0 %v1191_v9  ;;  %1938 = vmatpush3.msra.mxu1 %v1368_v8  ;;  %v1367_v9 = vld [vmem:[#allocation16 + $0x48] sm:$0xff] }
 0x15e   :  { %1931 = vmatmul.mubr.msk.f32.vlgmr.msra.gmra.mxu0 %vm177_vm1, %v2466_v31  ;;  %1962 = vmatprep.subr.mxu0 %v2268_v0  ;;  %vm1569_vm1 = vcmask 64512  }
 0x15f   :  { %1988 = vmatprep.mubr.msk.f32.mxu0 %vm2269_vm0, %v2268_v0  ;;  %1939 = vmatprep.subr.mxu1 %v2268_v0  ;;  %vm1563_vm0 = vcmask 130144  }
 0x160   :  { %1940 = vmatpush3.msra.mxu1 %v1367_v9 }
 0x161   :  { %1941 = vmatprep.subr.mxu1 %v2268_v0 }
 0x1f8   :  { %v592_v10 = vpop.f32.mrf.mxu0  ;;  %v673_v11 = vpop.f32.mrf.mxu1 }
 0x1f9   :  { %v593_v30 = vadd.f32 %v1656_v22, %v592_v10  ;;  %v674_v31 = vadd.f32 %v1658_v23, %v673_v11  ;;  %v1366_v10 = vld [vmem:[#allocation16 + $0x40] sm:$0xff]  ;;  %v1365_v11 = vld [vmem:[#allocation16 + $0x38] sm:$0xff] }
 0x1fa   :  { %v1844_v12 = vpop.f32.mrf.mxu0  ;;  %v1855_v13 = vpop.f32.mrf.mxu1  ;;  %1942 = vmatpush3.msra.mxu1 %v1366_v10 }
 0x1fb   :  { %v677_v37 = vmul.f32 %v674_v31, %v593_v30  ;;  %1943 = vmatprep.subr.mxu1 %v2268_v0  ;;  %v1364_v12 = vld [vmem:[#allocation16 + $0x30] sm:$0xff]  ;;  %v1363_v13 = vld [vmem:[#allocation16 + $0x28] sm:$0xff] }
 0x1fc   :  { %1944 = vmatpush3.msra.mxu1 %v1365_v11 }
 0x1fd   :  { %1945 = vmatprep.subr.mxu1 %v2268_v0 }
 0x1fe   :  { %1946 = vmatpush3.msra.mxu1 %v1364_v12 }
 0x1ff   :  { %1947 = vmatprep.subr.mxu1 %v2268_v0 }
 0x200   :  { %1948 = vmatpush3.msra.mxu1 %v1363_v13 }
 0x201   :  { %v760_v14 = vpop.f32.mrf.mxu0  ;;  %v843_v15 = vpop.f32.mrf.mxu1  ;;  %1949 = vmatprep.subr.mxu1 %v2268_v0 }
 0x202   :  { %v761_v28 = vadd.f32 %v1665_v18, %v760_v14  ;;  %v844_v29 = vadd.f32 %v1668_v19, %v843_v15  ;;  %v1362_v14 = vld [vmem:[#allocation16 + $0x20] sm:$0xff]  ;;  %v1361_v15 = vld [vmem:[#allocation16 + $0x18] sm:$0xff] }
 0x203   :  { %v1866_v16 = vpop.f32.mrf.mxu0  ;;  %v1877_v17 = vpop.f32.mrf.mxu1  ;;  %1950 = vmatpush3.msra.mxu1 %v1362_v14  ;;  %v1464_v18 = vld [vmem:[%s2714_s13 + $0x60] sm:$0xf]  ;;  %v1463_v19 = vld [vmem:[%s2714_s13 + $0x58] sm:$0xff] }
 0x204   :  { %v847_v34 = vmul.f32 %v844_v29, %v761_v28  ;;  %1951 = vmatprep.subr.mxu1 %v2268_v0  ;;  %v1360_v16 = vld [vmem:[#allocation16 + $0x10] sm:$0xff]  ;;  %v1359_v17 = vld [vmem:[#allocation16 + $0x8] sm:$0xff]  ;;  %1963 = vmatpush3.msk.msra.mxu0 %vm1375_vm2, %v1464_v18  ;;  %vm1571_vm2 = vcmask 97280  }
 0x205   :  { %1952 = vmatpush3.msra.mxu1 %v1361_v15  ;;  %1964 = vmatprep.subr.mxu0 %v2268_v0 }
 0x206   :  { %v848_v41 = vadd.f32 %v847_v34, %v677_v37  ;;  %1953 = vmatprep.subr.mxu1 %v2268_v0  ;;  %1965 = vmatpush3.msra.mxu0 %v1463_v19 }
 0x207   :  { %1954 = vmatpush3.msra.mxu1 %v1360_v16  ;;  %1966 = vmatprep.subr.mxu0 %v2268_v0 }
 0x208   :  { %1955 = vmatprep.subr.mxu1 %v2268_v0 }
 0x209   :  { %1956 = vmatpush3.msra.mxu1 %v1359_v17 }
 0x20a   :  { %1957 = vmatprep.subr.mxu1 %v2268_v0 }
 0x20b   :  { %v931_v20 = vpop.f32.mrf.mxu0  ;;  %v1014_v21 = vpop.f32.mrf.mxu1 }
 0x20c   :  { %v932_v32 = vadd.f32 %v1675_v24, %v931_v20  ;;  %v1015_v33 = vadd.f32 %v1678_v25, %v1014_v21  ;;  %v1358_v20 = vld [vmem:[#allocation16] sm:$0xff]  ;;  %v1462_v21 = vld [vmem:[%s2714_s13 + $0x50] sm:$0xff] }
 0x20d   :  { %v1888_v26 = vpop.f32.mrf.mxu0  ;;  %v1899_v27 = vpop.f32.mrf.mxu1  ;;  %1958 = vmatpush3.msra.mxu1 %v1358_v20  ;;  %1967 = vmatpush3.msra.mxu0 %v1462_v21 }
 0x20e   :  { %v1018_v38 = vmul.f32 %v1015_v33, %v932_v32  ;;  %1968 = vmatprep.subr.mxu0 %v2268_v0 }
 0x210   :  { %v1019_v46 = vadd.f32 %v1018_v38, %v848_v41 }
 0x215   :  { %v1102_v39 = vpop.f32.mrf.mxu0  ;;  %v1185_v40 = vpop.f32.mrf.mxu1 }
 0x216   :  { %v1103_v42 = vadd.f32 %v1685_v35, %v1102_v39  ;;  %v1186_v43 = vadd.f32 %v1688_v36, %v1185_v40 }
 0x217   :  { %v1910_v44 = vpop.f32.mrf.mxu0  ;;  %v1921_v45 = vpop.f32.mrf.mxu1 }
 0x218   :  { %v1189_v47 = vmul.f32 %v1186_v43, %v1103_v42  ;;  %v1461_v43 = vld [vmem:[%s2714_s13 + $0x48] sm:$0xff]  ;;  %v1460_v44 = vld [vmem:[%s2714_s13 + $0x40] sm:$0xff]  ;;  %v1459_v45 = vld [vmem:[%s2714_s13 + $0x38] sm:$0xff] }
 0x219   :  { %1969 = vmatpush3.msra.mxu0 %v1461_v43 }
 0x21a   :  { %v2586_v48 = vadd.f32 %v1189_v47, %v1019_v46  ;;  %1970 = vmatprep.subr.mxu0 %v2268_v0  ;;  %v1458_v46 = vld [vmem:[%s2714_s13 + $0x30] sm:$0xff]  ;;  %v1457_v47 = vld [vmem:[%s2714_s13 + $0x28] sm:$0xff] }
 0x21b   :  { %1971 = vmatpush3.msra.mxu0 %v1460_v44 }
 0x21c   :  { %1281 = vrot.lane.b32.xlu1 %v2586_v48, %s2270_s28  ;;  %1273 = vrot.lane.b32.xlu0 %v2586_v48, %s2271_s7 }
 0x21d   :  { %1972 = vmatprep.subr.mxu0 %v2268_v0 }
 0x21e   :  { %v2590_v49 = vpop.f32.mrf.mxu0  ;;  %1973 = vmatpush3.msra.mxu0 %v1459_v45 }
 0x21f   :  { %1974 = vmatprep.subr.mxu0 %v2268_v0 }
 0x220   :  { %v1932_v50 = vpop.f32.mrf.mxu0  ;;  %1285 = vrot.lane.b32.xlu1 %v2586_v48, %s2272_s9  ;;  %1277 = vrot.lane.b32.xlu0 %v2586_v48, %s2273_s8 }
 0x221   :  { %1975 = vmatpush3.msra.mxu0 %v1458_v46  ;;  %v1455_v50 = vld [vmem:[%s2714_s13 + $0x18] sm:$0xff] }
 0x222   :  { %1976 = vmatprep.subr.mxu0 %v2268_v0 }
 0x223   :  { %1977 = vmatpush3.msra.mxu0 %v1457_v47 }
 0x224   :  { %1293 = vrot.lane.b32.xlu1 %v2586_v48, %s2274_s12  ;;  %1289 = vrot.lane.b32.xlu0 %v2586_v48, %s2275_s23 }
 0x225   :  { %1978 = vmatprep.subr.mxu0 %v2268_v0 }
 0x228   :  { %1301 = vrot.lane.b32.xlu1 %v2586_v48, %s2276_s24  ;;  %1297 = vrot.lane.b32.xlu0 %v2586_v48, %s2277_s29 }
 0x22c   :  { %1305 = vrot.lane.b32.xlu0 %v2586_v48, %s2278_s30 }
 0x28e   :  { %v1282_v51 = vpop.permute.xlu1 %1281  ;;  %v1274_v52 = vpop.permute.xlu0 %1273 }
 0x28f   :  { %v1276_v53 = vmax.f32 %v2586_v48, %v1274_v52  ;;  %v1453_v52 = vld [vmem:[%s2714_s13 + $0x8] sm:$0xff] }
 0x292   :  { %v1286_v54 = vpop.permute.xlu1 %1285  ;;  %v1278_v55 = vpop.permute.xlu0 %1277 }
 0x293   :  { %v1280_v56 = vmax.f32 %v1276_v53, %v1278_v55  ;;  %v1452_v53 = vld [vmem:[%s2714_s13] sm:$0xff] }
 0x295   :  { %v1284_v57 = vmax.f32 %v1280_v56, %v1282_v51  ;;  %v1454_v51 = vld [vmem:[%s2714_s13 + $0x10] sm:$0xff]  ;;  %v1690_v56 = vld [vmem:[%s2712_s11] ss:$0 sm:$0xff]  ;;  %s2288_s11 = smov 120  }
 0x296   :  { %v1290_v58 = vpop.permute.xlu0 %1289  ;;  %v1294_v60 = vpop.permute.xlu1 %1293 }
 0x297   :  { %v1288_v59 = vmax.f32 %v1284_v57, %v1286_v54 }
 0x299   :  { %v1292_v61 = vmax.f32 %v1288_v59, %v1290_v58  ;;  %v1269_v58 = vadd.f32 %v1690_v56, %v2590_v49 }
 0x29a   :  { %v1298_v62 = vpop.permute.xlu0 %1297  ;;  %v1302_v2 = vpop.permute.xlu1 %1301 }
 0x29b   :  { %v1296_v63 = vmax.f32 %v1292_v61, %v1294_v60 }
 0x29d   :  { %v1300_v1 = vmax.f32 %v1296_v63, %v1298_v62 }
 0x29e   :  { %v1306_v5 = vpop.permute.xlu0 %1305 }
 0x29f   :  { %v1304_v4 = vmax.f32 %v1300_v1, %v1302_v2 }
 0x2a1   :  { %v2602_v6 = vmax.f32 %v1304_v4, %v1306_v5 }
 0x2a3   :  { %1313 = vrot.lane.b32.xlu0 %v2602_v6, %s2279_s1  ;;  %1310 = vrot.lane.b32.xlu1 %v2602_v6, %s2280_s16 }
 0x2a7   :  { %1319 = vrot.lane.b32.xlu0 %v2602_v6, %s2281_s6  ;;  %1316 = vrot.lane.b32.xlu1 %v2602_v6, %s2282_s17 }
 0x2ab   :  { %1325 = vrot.lane.b32.xlu0 %v2602_v6, %s2283_s10  ;;  %1322 = vrot.lane.b32.xlu1 %v2602_v6, %s2284_s18 }
 0x2af   :  { %1331 = vrot.lane.b32.xlu0 %v2602_v6, %s2285_s19  ;;  %1328 = vrot.lane.b32.xlu1 %v2602_v6, %s2286_s0 }
 0x2b3   :  { %1334 = vrot.lane.b32.xlu1 %v2602_v6, %s2287_s20 }
 0x315   :  { %v1314_v22 = vpop.permute.xlu0 %1313  ;;  %v1311_v23 = vpop.permute.xlu1 %1310 }
 0x316   :  { %v1338_v24 = vsel %vm1337_vm3, %v2602_v6, %v1311_v23  ;;  %vm1626_vm3 = vcmask 850944  }
 0x317   :  { %v1340_v26 = vsel %vm1339_vm4, %v1338_v24, %v1314_v22 }
 0x319   :  { %v1320_v25 = vpop.permute.xlu0 %1319  ;;  %v1317_v27 = vpop.permute.xlu1 %1316 }
 0x31a   :  { %v1342_v28 = vsel %vm1341_vm5, %v1340_v26, %v1317_v27 }
 0x31b   :  { %v1344_v30 = vsel %vm1343_vm6, %v1342_v28, %v1320_v25 }
 0x31d   :  { %v1326_v29 = vpop.permute.xlu0 %1325  ;;  %v1323_v31 = vpop.permute.xlu1 %1322 }
 0x31e   :  { %v1346_v32 = vsel %vm1345_vm7, %v1344_v30, %v1323_v31 }
 0x31f   :  { %v1348_v33 = vsel %vm1347_vm8, %v1346_v32, %v1326_v29 }
 0x321   :  { %v1329_v34 = vpop.permute.xlu1 %1328  ;;  %v1332_v35 = vpop.permute.xlu0 %1331 }
 0x322   :  { %v1350_v36 = vsel %vm1349_vm9, %v1348_v33, %v1329_v34 }
 0x323   :  { %v1352_v37 = vsel %vm1351_vm10, %v1350_v36, %v1332_v35 }
 0x325   :  { %v1335_v38 = vpop.permute.xlu1 %1334 }
 0x326   :  { %v1354_v39 = vsel %vm1353_vm11, %v1352_v37, %v1335_v38 }
 0x327   :  { %v1355_v40 = vsub.f32 %v2586_v48, %v1354_v39  ;;  %v1456_v48 = vld [vmem:[%s2714_s13 + $0x20] sm:$0xff] }
 0x328   :  { %1979 = vmatpush3.msra.mxu0 %v1456_v48 }
 0x329   :  { %v1356_v41 = vmul.f32 1.442695, %v1355_v40  ;;  %1980 = vmatprep.subr.mxu0 %v2268_v0 }
 0x32a   :  { %1981 = vmatpush3.msra.mxu0 %v1455_v50 }
 0x32b   :  { %2029 = vpow2.f32 %v1356_v41  ;;  %1982 = vmatprep.subr.mxu0 %v2268_v0 }
 0x32c   :  { %1983 = vmatpush3.msra.mxu0 %v1454_v51 }
 0x32d   :  { %1984 = vmatprep.subr.mxu0 %v2268_v0 }
 0x32e   :  { %1985 = vmatpush3.msra.mxu0 %v1453_v52 }
 0x32f   :  { %1986 = vmatprep.subr.mxu0 %v2268_v0  ;;  %v1694_v0 = vld [vmem:[%s2715_s14] ss:$0 sm:$0xff]  ;;  %s2289_s14 = smov 124  }
 0x330   :  { %1987 = vmatpush3.msra.mxu0 %v1452_v53 }
 0x338   :  { %v2030_v42 = vpop.eup %2029 }
 0x339   :  { %1960 = vmatmul.mubr.msk.f32.vlgmr.msra.gmra.mxu1 %vm1371_vm12, %v2030_v42 }
 0x3f9   :  { %v1445_v54 = vpop.f32.mrf.mxu1 }
 0x3fa   :  { %2031 = vrcp.f32 %v1445_v54 }
 0x3fb   :  { %v1961_v55 = vpop.f32.mrf.mxu1 }
 0x407   :  { %v2032_v57 = vpop.eup %2031 }
 0x408   :  { %v2683_v59 = vmul.f32 %v2032_v57, %v2030_v42 }
 0x40a   :  { %v1451_v60 = vmul.f32 %v2683_v59, %v1269_v58 }
 0x40c   :  { %1989 = vmatmul.mubr.msk.f32.vlgmr.msra.gmra.mxu0 %vm1371_vm12, %v1451_v60 }
 0x4cc   :  { %v1544_v61 = vpop.f32.mrf.mxu0 }
 0x4cd   :  { %v1545_v62 = vadd.f32 %v1694_v0, %v1544_v61 }
 0x4ce   :  { %v1990_v63 = vpop.f32.mrf.mxu0 }
 0x4cf   :  { %v1554_v1 = vsel %vm1553_vm13, %v1545_v62, -inf  ;;  %v1549_v2 = vsel %vm1548_vm14, %v1545_v62, -inf  ;;  %v1559_v49 = vsel %vm1558_vm15, %v1545_v62, -inf  ;;  %v1564_v3 = vsel %vm1563_vm0, %v1545_v62, -inf }
 0x4d0   :  { %1555 = vmax.xlane.f32.xlu1 %v1554_v1  ;;  %1550 = vmax.xlane.f32.xlu0 %v1549_v2 }
 0x4d4   :  { %1560 = vmax.xlane.f32.xlu0 %v1559_v49 }
 0x4d8   :  { %1565 = vmax.xlane.f32.xlu0 %v1564_v3 }
 0x559   :  { %v1551_v4 = vpop.xlane.xlu0 %1550  ;;  %v1556_v5 = vpop.xlane.xlu1 %1555 }
 0x55a   :  { %v1557_v7 = vsub.f32 %v1545_v62, %v1556_v5  ;;  %v1552_v8 = vsub.f32 %v1545_v62, %v1551_v4 }
 0x55c   :  { %v1568_v11 = vsel %vm1548_vm14, %v1552_v8, %v1557_v7 }
 0x55d   :  { %v1561_v6 = vpop.xlane.xlu0 %1560 }
 0x55e   :  { %v1562_v9 = vsub.f32 %v1545_v62, %v1561_v6 }
 0x560   :  { %v1570_v13 = vsel %vm1569_vm1, %v1568_v11, %v1562_v9 }
 0x561   :  { %v1566_v10 = vpop.xlane.xlu0 %1565 }
 0x562   :  { %v1567_v12 = vsub.f32 %v1545_v62, %v1566_v10 }
 0x564   :  { %v1572_v14 = vsel %vm1571_vm2, %v1570_v13, %v1567_v12 }
 0x565   :  { %v1573_v15 = vmul.f32 1.442695, %v1572_v14 }
 0x567   :  { %2033 = vpow2.f32 %v1573_v15 }
 0x574   :  { %v2034_v16 = vpop.eup %2033 }
 0x575   :  { %1594 = vrot.lane.b32.xlu0 %v2034_v16, %s2288_s11  ;;  %1581 = vrot.lane.b32.xlu1 %v2034_v16, %s2289_s14  ;;  %v1575_v23 = vsel %vm1548_vm14, %v2034_v16, 0.0 }
 0x579   :  { %1607 = vrot.lane.b32.xlu1 %v2034_v16, %s2290_s22 }
 0x5e7   :  { %v1595_v17 = vpop.permute.xlu0 %1594  ;;  %v1582_v18 = vpop.permute.xlu1 %1581 }
 0x5e8   :  { %v1597_v19 = vsel %vm1548_vm14, %v1595_v17, 0.0  ;;  %v1584_v20 = vsel %vm1548_vm14, %v1582_v18, 0.0 }
 0x5e9   :  { %1598 = vadd.xlane.f32.xlu0 %v1597_v19  ;;  %1585 = vadd.xlane.f32.xlu1 %v1584_v20 }
 0x5eb   :  { %v1608_v21 = vpop.permute.xlu1 %1607 }
 0x5ec   :  { %v1610_v22 = vsel %vm1548_vm14, %v1608_v21, 0.0 }
 0x5ed   :  { %1611 = vadd.xlane.f32.xlu0 %v1610_v22  ;;  %1576 = vadd.xlane.f32.xlu1 %v1575_v23 }
 0x672   :  { %v1599_v24 = vpop.xlane.xlu0 %1598  ;;  %v1586_v25 = vpop.xlane.xlu1 %1585 }
 0x673   :  { %2035 = vrcp.f32 %v1599_v24 }
 0x674   :  { %2037 = vrcp.f32 %v1586_v25 }
 0x676   :  { %v1612_v26 = vpop.xlane.xlu0 %1611  ;;  %v1577_v33 = vpop.xlane.xlu1 %1576 }
 0x677   :  { %2039 = vrcp.f32 %v1612_v26 }
 0x678   :  { %2041 = vrcp.f32 %v1577_v33 }
 0x680   :  { %v2036_v27 = vpop.eup %2035 }
 0x681   :  { %v2038_v28 = vpop.eup %2037  ;;  %v1601_v29 = vmul.f32 %v2036_v27, %v2034_v16 }
 0x682   :  { %v1588_v30 = vmul.f32 %v2038_v28, %v2034_v16 }
 0x683   :  { %1603 = vrot.lane.b32.xlu1 %v1601_v29, %s2288_s11 }
 0x684   :  { %v2040_v31 = vpop.eup %2039  ;;  %1590 = vrot.lane.b32.xlu0 %v1588_v30, %s2289_s14 }
 0x685   :  { %v1614_v32 = vmul.f32 %v2040_v31, %v2034_v16  ;;  %v2042_v34 = vpop.eup %2041 }
 0x686   :  { %v1579_v35 = vmul.f32 %v2042_v34, %v2034_v16 }
 0x687   :  { %1616 = vrot.lane.b32.xlu1 %v1614_v32, %s2290_s22 }
 0x6f5   :  { %v1604_v36 = vpop.permute.xlu1 %1603 }
 0x6f6   :  { %v1591_v37 = vpop.permute.xlu0 %1590 }
 0x6f7   :  { %v1593_v38 = vadd.f32 %v1591_v37, %v1579_v35 }
 0x6f9   :  { %v1606_v39 = vadd.f32 %v1604_v36, %v1593_v38  ;;  %v1617_v40 = vpop.permute.xlu1 %1616 }
 0x6fb   :  { %v1619_v41 = vadd.f32 %v1617_v40, %v1606_v39 }
 0x6fd   :  { %v1620_v42 = vmul.f32 0.25, %v1619_v41 }
 0x6ff   :  { %1622 = vrot.lane.b32.xlu0 %v1620_v42, %s2291_s2 }
 0x771   :  { %v1623_v43 = vpop.permute.xlu0 %1622 }
 0x772   :  { %v1625_v44 = vsel %vm1371_vm12, %v2683_v59, %v1623_v43 }
 0x773   :  { %v1627_v45 = vsel %vm1626_vm3, %v1625_v44, 0.0 }
 0x774   :  { %1628 = vst [vmem:[#allocation17] sm:$0xff] %v1627_v45 }
 0x775   :  { %2234 = shalt.err (!%p2231_p7)
}
 0x776   :  { %1638 = dma.vmem_to_hbm [thread:$0]  %s1636_s26, 128, %s2716_s15, [#allocation4]  }
 0x777   :  { %2253 = dma.done.wait [#allocation4], 128  }
 0x778   :  { %2254 = vsyncadd [#allocation4], 4294967168 }
 0x779   :  { %1642 = vsyncpa [#allocation3], 1 }
 0x77a   :  { %1643 = vsyncpa [#allocation6], 1 }
 0x77b   :  { %1644 = vsyncpa [#allocation9], 1 }
 0x77c   :  { %1645 = vsyncpa [#allocation12], 1 }
 0x77d   :  { %1646 = vsyncpa [#allocation15], 1 }
 0x77e   :  { %1647 = vsyncpa [#allocation4], 1 }

</bundles_post_ra>
